<compile_context>
chip_gen: v7x
topology: tpu7x:2x2x1
jax: 0.10.0
libtpu: 0.0.40
codegen_flags: <defaults>
</compile_context>

<pallas_src>
import functools

import jax
import jax.numpy as jnp
from jax.experimental import pallas as pl
from jax.experimental.pallas import tpu as pltpu

HID1 = 16        # hidden width of nn1
HID2 = 8         # hidden width of nn2
LANE = 128       # lane-dense padded output / slab width
NEG_INF = -1e30  # padding value for unused fc-bias columns


def _round_up(v, m):
    return (v + m - 1) // m * m


def _slab_layout(num_features):
    """Ordered (name, rows, cols) pieces and 8-aligned row offsets."""
    pieces = [
        ("w1a", num_features, HID1), ("b1a", 1, HID1),
        ("w1b", HID1, HID1),         ("b1b", 1, HID1),
        ("w2a", HID1, HID2),         ("b2a", 1, HID2),
        ("w2b", HID2, HID2),         ("b2b", 1, HID2),
        ("wfc", HID2, LANE),         ("bfc", 1, LANE),
    ]
    offsets, r = {}, 0
    for name, rows, _ in pieces:
        offsets[name] = r
        r += _round_up(rows, 8)
    return pieces, offsets, r


def pack_params(params, num_features, num_classes):
    """Pack all weights/biases into one (rows, 128) f32 slab.

    Every piece starts at an 8-aligned row so the kernel's static slices are
    sublane-aligned views.  fc-bias padding columns are -1e30 so padded
    logits never win in log_softmax; all other padding is zero.
    """
    del num_classes
    pieces, offsets, total = _slab_layout(num_features)

    def pad_piece(a, row_block, col_fill):
        a = a.astype(jnp.float32)
        a = jnp.pad(a, ((0, 0), (0, LANE - a.shape[1])), constant_values=col_fill)
        return jnp.pad(a, ((0, row_block - a.shape[0]), (0, 0)))

    blocks = []
    for name, rows, _ in pieces:
        fill = NEG_INF if name == "bfc" else 0.0
        blocks.append(pad_piece(params[name], _round_up(rows, 8), fill))
    slab = jnp.concatenate(blocks, axis=0)
    assert slab.shape == (total, LANE), (slab.shape, total)
    return slab


def _gin_kernel(x_ref, adj_ref, pool_ref, w_ref, out_ref, *, off, num_features):
    """One super-block (Bb mini-batches, block-diagonal) per grid step.

    x_ref   : (Bb*N, Fp)     stacked node features, f32 (Fp = 8-padded F)
    adj_ref : (Bb*N, Bb*N)   block-diagonal (A + I) per mini-batch, bf16
    pool_ref: (Bb*G, Bb*N)   block-diagonal mean-pool matrices, bf16
    w_ref   : (R, 128)       packed weight/bias slab (8-aligned rows), f32
    out_ref : (Bb*G, 128)    lane/sublane-dense padded log-probabilities
    """
    f32 = jnp.float32
    Fp = _round_up(num_features, 8)

    # 8-aligned static slices of the slab ref: plain vreg-aligned loads.
    w1a = w_ref[off["w1a"]:off["w1a"] + Fp, :HID1]     # zero rows >= F
    b1a = w_ref[off["b1a"]:off["b1a"] + 1, :HID1]
    w1b = w_ref[off["w1b"]:off["w1b"] + HID1, :HID1]
    b1b = w_ref[off["b1b"]:off["b1b"] + 1, :HID1]
    w2a = w_ref[off["w2a"]:off["w2a"] + HID1, :HID2]
    b2a = w_ref[off["b2a"]:off["b2a"] + 1, :HID2]
    w2b = w_ref[off["w2b"]:off["w2b"] + HID2, :HID2]
    b2b = w_ref[off["b2b"]:off["b2b"] + 1, :HID2]
    wfc = w_ref[off["wfc"]:off["wfc"] + HID2, :]       # zero cols >= C
    bfc = w_ref[off["bfc"]:off["bfc"] + 1, :]          # -1e30 cols >= C

    x = x_ref[...]                                     # (M, Fp) f32
    adj = adj_ref[...].astype(f32)                     # exact small integers
    pool = pool_ref[...].astype(f32)                   # exact 1/|V| here

    # ---- GINConv 1: MLP1( (I+A) @ x ), then post-conv ReLU ----
    agg1 = jnp.dot(adj, x, preferred_element_type=f32)                # (M, Fp)
    h = jnp.maximum(jnp.dot(agg1, w1a, preferred_element_type=f32) + b1a, 0.0)
    h = jnp.maximum(jnp.dot(h, w1b, preferred_element_type=f32) + b1b, 0.0)
    # F.dropout(training=False) is the identity.

    # ---- GINConv 2 ----
    agg2 = jnp.dot(adj, h, preferred_element_type=f32)                # (M, HID1)
    h2 = jnp.maximum(jnp.dot(agg2, w2a, preferred_element_type=f32) + b2a, 0.0)
    h2 = jnp.maximum(jnp.dot(h2, w2b, preferred_element_type=f32) + b2b, 0.0)

    # ---- global mean pool + fc + log_softmax (dim=1) ----
    pooled = jnp.dot(pool, h2, preferred_element_type=f32)            # (P, HID2)
    logits = jnp.dot(pooled, wfc, preferred_element_type=f32) + bfc   # (P, 128)
    m = jnp.max(logits, axis=-1, keepdims=True)
    z = logits - m
    lse = jnp.log(jnp.sum(jnp.exp(z), axis=-1, keepdims=True))
    out_ref[...] = z - lse


def build_dense(edge_index, batch, n_nodes, num_graphs):
    """Dense (A + I) adjacency and mean-pool matrix for one mini-batch."""
    src, dst = edge_index[0], edge_index[1]
    # messages flow source -> target (PyG default); I added AFTER the scatter
    # so duplicate edges / explicit self-loops count exactly like x + A@x
    # with eps = 0.
    adj = jnp.zeros((n_nodes, n_nodes), jnp.float32).at[dst, src].add(1.0)
    adj = adj + jnp.eye(n_nodes, dtype=jnp.float32)

    onehot = (batch[None, :] == jnp.arange(num_graphs)[:, None]).astype(jnp.float32)
    counts = jnp.maximum(onehot.sum(axis=1, keepdims=True), 1.0)
    pool = onehot / counts
    return adj, pool


def gin_forward_batched(x, adj_plus_i, pool, wslab, num_classes, *, mb_per_step=8):
    """x: (B,N,F), adj_plus_i: (B,N,N), pool: (B,G,N), wslab: (R,128)."""
    B, N, F = x.shape
    G = pool.shape[1]
    R = wslab.shape[0]
    Bb = min(mb_per_step, B)
    assert B % Bb == 0, "number of mini-batches must be divisible by mb_per_step"
    n_super = B // Bb
    Fp = _round_up(F, 8)
    M, P = Bb * N, Bb * G            # super-block node rows / pooled rows

    # --- super-block (block-diagonal) layout, built once in XLA ---
    x_sb = jnp.pad(x, ((0, 0), (0, 0), (0, Fp - F))).reshape(n_super, M, Fp)
    eye_b = jnp.eye(Bb, dtype=jnp.float32)
    adj_sb = jnp.einsum("sbij,bc->sbicj",
                        adj_plus_i.reshape(n_super, Bb, N, N),
                        eye_b).reshape(n_super, M, M).astype(jnp.bfloat16)
    pool_sb = jnp.einsum("sbgj,bc->sbgcj",
                         pool.reshape(n_super, Bb, G, N),
                         eye_b).reshape(n_super, P, M).astype(jnp.bfloat16)

    _, offsets, total = _slab_layout(F)
    assert R == total, (R, total)
    kernel = functools.partial(_gin_kernel, off=offsets, num_features=F)

    flops_per_step = (
        2 * M * M * Fp + 2 * M * Fp * HID1 + 2 * M * HID1 * HID1
        + 2 * M * M * HID1 + 2 * M * HID1 * HID2 + 2 * M * HID2 * HID2
        + 2 * P * M * HID2 + 2 * P * HID2 * LANE)
    bytes_accessed = (4 * x_sb.size + 2 * adj_sb.size + 2 * pool_sb.size
                      + 4 * wslab.size                # slab counted once
                      + 4 * n_super * P * LANE)
    cost = pl.CostEstimate(flops=int(n_super * flops_per_step),
                           transcendentals=int(n_super * P * LANE),
                           bytes_accessed=int(bytes_accessed))

    out = pl.pallas_call(
        kernel,
        out_shape=jax.ShapeDtypeStruct((n_super, P, LANE), jnp.float32),
        grid=(n_super,),
        in_specs=[
            pl.BlockSpec((None, M, Fp), lambda s: (s, 0, 0)),    # stacked x
            pl.BlockSpec((None, M, M), lambda s: (s, 0, 0)),     # block-diag A+I
            pl.BlockSpec((None, P, M), lambda s: (s, 0, 0)),     # block-diag pool
            pl.BlockSpec((R, LANE), lambda s: (0, 0)),           # weight slab
        ],
        out_specs=pl.BlockSpec((None, P, LANE), lambda s: (s, 0, 0)),
        compiler_params=pltpu.CompilerParams(
            dimension_semantics=("parallel",)),
        cost_estimate=cost,
    )(x_sb, adj_sb, pool_sb, wslab)

    return out.reshape(B, G, LANE)[:, :, :num_classes]


def init_params(key, num_features, num_classes):
    """Deterministic synthetic init matching the PyTorch module's shapes."""
    ks = jax.random.split(key, 5)

    def lin(k, fan_in, fan_out):
        kw, kb = jax.random.split(k)
        bound = 1.0 / jnp.sqrt(jnp.float32(fan_in))
        w = jax.random.uniform(kw, (fan_in, fan_out), jnp.float32, -bound, bound)
        b = jax.random.uniform(kb, (1, fan_out), jnp.float32, -bound, bound)
        return w, b

    w1a, b1a = lin(ks[0], num_features, HID1)   # nn1: Linear(num_features, 16)
    w1b, b1b = lin(ks[1], HID1, HID1)           # nn1: Linear(16, 16)
    w2a, b2a = lin(ks[2], HID1, HID2)           # nn2: Linear(16, 8)
    w2b, b2b = lin(ks[3], HID2, HID2)           # nn2: Linear(8, 8)
    wfc, bfc = lin(ks[4], HID2, num_classes)    # fc : Linear(8, num_classes)
    return dict(w1a=w1a, b1a=b1a, w1b=w1b, b1b=b1b,
                w2a=w2a, b2a=b2a, w2b=w2b, b2b=b2b,
                wfc=wfc, bfc=bfc)


if __name__ == "__main__":
    key = jax.random.PRNGKey(0)
    k_p, k_data = jax.random.split(key)

    # ENZYMES-like small problem: 3 input node features, 6 classes.
    num_features, num_classes = 3, 6
    n_nodes, n_edges, num_graphs = 32, 96, 4
    n_batches = 32            # graph mini-batches per launch
    mb_per_step = 8           # -> 4 grid steps, M = 256 node rows per step

    params = init_params(k_p, num_features, num_classes)
    wslab = pack_params(params, num_features, num_classes)

    nodes_per_graph = n_nodes // num_graphs
    batch_assign = jnp.repeat(jnp.arange(num_graphs, dtype=jnp.int32),
                              nodes_per_graph)

    xs, adjs, pools = [], [], []
    for kb in jax.random.split(k_data, n_batches):
        k_x, k_g, k_s, k_d = jax.random.split(kb, 4)
        x = jax.random.normal(k_x, (n_nodes, num_features), jnp.float32)
        # per-graph edge sets (no cross-graph edges) so the batched block
        # structure is actually exercised.
        e_graph = jax.random.randint(k_g, (n_edges,), 0, num_graphs, jnp.int32)
        e_src = jax.random.randint(k_s, (n_edges,), 0, nodes_per_graph, jnp.int32)
        e_dst = jax.random.randint(k_d, (n_edges,), 0, nodes_per_graph, jnp.int32)
        edge_index = jnp.stack([e_graph * nodes_per_graph + e_src,
                                e_graph * nodes_per_graph + e_dst])
        adj, pool = build_dense(edge_index, batch_assign, n_nodes, num_graphs)
        xs.append(x); adjs.append(adj); pools.append(pool)
    x_b, adj_b, pool_b = jnp.stack(xs), jnp.stack(adjs), jnp.stack(pools)

    out = gin_forward_batched(x_b, adj_b, pool_b, wslab, num_classes,
                              mb_per_step=mb_per_step)
    out = jax.block_until_ready(out)

    # pure-JAX reference (same math, un-packed f32 weights)
    def ref_fwd(x, adj, pool):
        h = adj @ x
        h = jnp.maximum(h @ params["w1a"] + params["b1a"], 0.0)
        h = jnp.maximum(h @ params["w1b"] + params["b1b"], 0.0)
        h2 = adj @ h
        h2 = jnp.maximum(h2 @ params["w2a"] + params["b2a"], 0.0)
        h2 = jnp.maximum(h2 @ params["w2b"] + params["b2b"], 0.0)
        p = pool @ h2
        logits = p @ params["wfc"] + params["bfc"]
        return jax.nn.log_softmax(logits, axis=1)

    ref = jax.vmap(ref_fwd)(x_b, adj_b, pool_b)

    assert out.shape == (n_batches, num_graphs, num_classes)
    assert bool(jnp.all(jnp.abs(jnp.exp(out).sum(axis=-1) - 1.0) < 1e-4))
    assert bool(jnp.allclose(out, ref, atol=1e-4, rtol=1e-4))
    print("KERNEL_OK")
</pallas_src>

<mosaic_0001>
module attributes {stable_mosaic.version = 11 : i64} {
  func.func @_gin_kernel(%arg0: i32, %arg1: memref<1x256x8xf32, #tpu.memory_space<vmem>>, %arg2: memref<1x256x256xbf16, #tpu.memory_space<vmem>>, %arg3: memref<1x32x256xbf16, #tpu.memory_space<vmem>>, %arg4: memref<96x128xf32, #tpu.memory_space<vmem>>, %arg5: memref<1x32x128xf32, #tpu.memory_space<vmem>>) attributes {dimension_semantics = [#tpu.dimension_semantics<parallel>], iteration_bounds = array<i64: 4>, scalar_prefetch = 0 : i64, scratch_operands = 0 : i64, tpu.core_type = #tpu.core_type<tc>, window_params = [{transform_indices = @transform_0, window_bounds = array<i64: 1, 256, 8>}, {transform_indices = @transform_1, window_bounds = array<i64: 1, 256, 256>}, {transform_indices = @transform_2, window_bounds = array<i64: 1, 32, 256>}, {pipeline_mode = #tpu.pipeline_mode<synchronous>, transform_indices = @transform_3, window_bounds = array<i64: 96, 128>}, {transform_indices = @transform_4, window_bounds = array<i64: 1, 32, 128>}]} {
    %c0 = arith.constant 0 : index
    %c0_0 = arith.constant 0 : index
    %0 = vector.load %arg4[%c0, %c0_0] : memref<96x128xf32, #tpu.memory_space<vmem>>, vector<8x16xf32>
    %c8 = arith.constant 8 : index
    %c0_1 = arith.constant 0 : index
    %1 = vector.load %arg4[%c8, %c0_1] : memref<96x128xf32, #tpu.memory_space<vmem>>, vector<1x16xf32>
    %c16 = arith.constant 16 : index
    %c0_2 = arith.constant 0 : index
    %2 = vector.load %arg4[%c16, %c0_2] : memref<96x128xf32, #tpu.memory_space<vmem>>, vector<16x16xf32>
    %c32 = arith.constant 32 : index
    %c0_3 = arith.constant 0 : index
    %3 = vector.load %arg4[%c32, %c0_3] : memref<96x128xf32, #tpu.memory_space<vmem>>, vector<1x16xf32>
    %c40 = arith.constant 40 : index
    %c0_4 = arith.constant 0 : index
    %4 = vector.load %arg4[%c40, %c0_4] : memref<96x128xf32, #tpu.memory_space<vmem>>, vector<16x8xf32>
    %c56 = arith.constant 56 : index
    %c0_5 = arith.constant 0 : index
    %5 = vector.load %arg4[%c56, %c0_5] : memref<96x128xf32, #tpu.memory_space<vmem>>, vector<1x8xf32>
    %c64 = arith.constant 64 : index
    %c0_6 = arith.constant 0 : index
    %6 = vector.load %arg4[%c64, %c0_6] : memref<96x128xf32, #tpu.memory_space<vmem>>, vector<8x8xf32>
    %c72 = arith.constant 72 : index
    %c0_7 = arith.constant 0 : index
    %7 = vector.load %arg4[%c72, %c0_7] : memref<96x128xf32, #tpu.memory_space<vmem>>, vector<1x8xf32>
    %c80 = arith.constant 80 : index
    %c0_8 = arith.constant 0 : index
    %8 = vector.load %arg4[%c80, %c0_8] : memref<96x128xf32, #tpu.memory_space<vmem>>, vector<8x128xf32>
    %c88 = arith.constant 88 : index
    %c0_9 = arith.constant 0 : index
    %9 = vector.load %arg4[%c88, %c0_9] : memref<96x128xf32, #tpu.memory_space<vmem>>, vector<1x128xf32>
    %c0_10 = arith.constant 0 : index
    %c0_11 = arith.constant 0 : index
    %c0_12 = arith.constant 0 : index
    %10 = vector.load %arg1[%c0_10, %c0_11, %c0_12] : memref<1x256x8xf32, #tpu.memory_space<vmem>>, vector<1x256x8xf32>
    %11 = vector.shape_cast %10 : vector<1x256x8xf32> to vector<256x8xf32>
    %c0_13 = arith.constant 0 : index
    %c0_14 = arith.constant 0 : index
    %c0_15 = arith.constant 0 : index
    %12 = vector.load %arg2[%c0_13, %c0_14, %c0_15] : memref<1x256x256xbf16, #tpu.memory_space<vmem>>, vector<1x256x256xbf16>
    %13 = vector.shape_cast %12 : vector<1x256x256xbf16> to vector<256x256xbf16>
    %14 = arith.extf %13 : vector<256x256xbf16> to vector<256x256xf32>
    %c0_16 = arith.constant 0 : index
    %c0_17 = arith.constant 0 : index
    %c0_18 = arith.constant 0 : index
    %15 = vector.load %arg3[%c0_16, %c0_17, %c0_18] : memref<1x32x256xbf16, #tpu.memory_space<vmem>>, vector<1x32x256xbf16>
    %16 = vector.shape_cast %15 : vector<1x32x256xbf16> to vector<32x256xbf16>
    %17 = arith.extf %16 : vector<32x256xbf16> to vector<32x256xf32>
    %cst = arith.constant dense<0.000000e+00> : vector<256x8xf32>
    %18 = tpu.matmul %14, %11, %cst {dimension_numbers = #tpu.dot_dimension_numbers<[1], [0], [0], [1], [0, 0, 1, 1], [], []>} : vector<256x256xf32>, vector<256x8xf32>, vector<256x8xf32> -> vector<256x8xf32>
    %cst_19 = arith.constant dense<0.000000e+00> : vector<256x16xf32>
    %19 = tpu.matmul %18, %0, %cst_19 {dimension_numbers = #tpu.dot_dimension_numbers<[1], [0], [0], [1], [0, 0, 1, 1], [], []>} : vector<256x8xf32>, vector<8x16xf32>, vector<256x16xf32> -> vector<256x16xf32>
    %20 = vector.broadcast %1 : vector<1x16xf32> to vector<256x16xf32>
    %21 = arith.addf %19, %20 : vector<256x16xf32>
    %cst_20 = arith.constant 0.000000e+00 : f32
    %22 = vector.broadcast %cst_20 : f32 to vector<256x16xf32>
    %23 = arith.maximumf %21, %22 : vector<256x16xf32>
    %cst_21 = arith.constant dense<0.000000e+00> : vector<256x16xf32>
    %24 = tpu.matmul %23, %2, %cst_21 {dimension_numbers = #tpu.dot_dimension_numbers<[1], [0], [0], [1], [0, 0, 1, 1], [], []>} : vector<256x16xf32>, vector<16x16xf32>, vector<256x16xf32> -> vector<256x16xf32>
    %25 = vector.broadcast %3 : vector<1x16xf32> to vector<256x16xf32>
    %26 = arith.addf %24, %25 : vector<256x16xf32>
    %cst_22 = arith.constant 0.000000e+00 : f32
    %27 = vector.broadcast %cst_22 : f32 to vector<256x16xf32>
    %28 = arith.maximumf %26, %27 : vector<256x16xf32>
    %cst_23 = arith.constant dense<0.000000e+00> : vector<256x16xf32>
    %29 = tpu.matmul %14, %28, %cst_23 {dimension_numbers = #tpu.dot_dimension_numbers<[1], [0], [0], [1], [0, 0, 1, 1], [], []>} : vector<256x256xf32>, vector<256x16xf32>, vector<256x16xf32> -> vector<256x16xf32>
    %cst_24 = arith.constant dense<0.000000e+00> : vector<256x8xf32>
    %30 = tpu.matmul %29, %4, %cst_24 {dimension_numbers = #tpu.dot_dimension_numbers<[1], [0], [0], [1], [0, 0, 1, 1], [], []>} : vector<256x16xf32>, vector<16x8xf32>, vector<256x8xf32> -> vector<256x8xf32>
    %31 = vector.broadcast %5 : vector<1x8xf32> to vector<256x8xf32>
    %32 = arith.addf %30, %31 : vector<256x8xf32>
    %cst_25 = arith.constant 0.000000e+00 : f32
    %33 = vector.broadcast %cst_25 : f32 to vector<256x8xf32>
    %34 = arith.maximumf %32, %33 : vector<256x8xf32>
    %cst_26 = arith.constant dense<0.000000e+00> : vector<256x8xf32>
    %35 = tpu.matmul %34, %6, %cst_26 {dimension_numbers = #tpu.dot_dimension_numbers<[1], [0], [0], [1], [0, 0, 1, 1], [], []>} : vector<256x8xf32>, vector<8x8xf32>, vector<256x8xf32> -> vector<256x8xf32>
    %36 = vector.broadcast %7 : vector<1x8xf32> to vector<256x8xf32>
    %37 = arith.addf %35, %36 : vector<256x8xf32>
    %cst_27 = arith.constant 0.000000e+00 : f32
    %38 = vector.broadcast %cst_27 : f32 to vector<256x8xf32>
    %39 = arith.maximumf %37, %38 : vector<256x8xf32>
    %cst_28 = arith.constant dense<0.000000e+00> : vector<32x8xf32>
    %40 = tpu.matmul %17, %39, %cst_28 {dimension_numbers = #tpu.dot_dimension_numbers<[1], [0], [0], [1], [0, 0, 1, 1], [], []>} : vector<32x256xf32>, vector<256x8xf32>, vector<32x8xf32> -> vector<32x8xf32>
    %cst_29 = arith.constant dense<0.000000e+00> : vector<32x128xf32>
    %41 = tpu.matmul %40, %8, %cst_29 {dimension_numbers = #tpu.dot_dimension_numbers<[1], [0], [0], [1], [0, 0, 1, 1], [], []>} : vector<32x8xf32>, vector<8x128xf32>, vector<32x128xf32> -> vector<32x128xf32>
    %42 = vector.broadcast %9 : vector<1x128xf32> to vector<32x128xf32>
    %43 = arith.addf %41, %42 : vector<32x128xf32>
    %cst_30 = arith.constant dense<0xFF800000> : vector<32xf32>
    %44 = vector.multi_reduction <maximumf>, %43, %cst_30 [1] : vector<32x128xf32> to vector<32xf32>
    %45 = vector.shape_cast %44 : vector<32xf32> to vector<32x1xf32>
    %46 = vector.broadcast %45 : vector<32x1xf32> to vector<32x128xf32>
    %47 = arith.subf %43, %46 : vector<32x128xf32>
    %48 = math.exp %47 : vector<32x128xf32>
    %cst_31 = arith.constant dense<0.000000e+00> : vector<32xf32>
    %49 = vector.multi_reduction <add>, %48, %cst_31 [1] : vector<32x128xf32> to vector<32xf32>
    %50 = vector.shape_cast %49 : vector<32xf32> to vector<32x1xf32>
    %51 = math.log %50 : vector<32x1xf32>
    %52 = vector.broadcast %51 : vector<32x1xf32> to vector<32x128xf32>
    %53 = arith.subf %47, %52 : vector<32x128xf32>
    %c0_32 = arith.constant 0 : index
    %c0_33 = arith.constant 0 : index
    %c0_34 = arith.constant 0 : index
    %54 = vector.load %arg5[%c0_32, %c0_33, %c0_34] : memref<1x32x128xf32, #tpu.memory_space<vmem>>, vector<1x32x128xf32>
    %55 = vector.shape_cast %54 : vector<1x32x128xf32> to vector<32x128xf32>
    %56 = vector.shape_cast %53 : vector<32x128xf32> to vector<1x32x128xf32>
    tpu.vector_store %arg5[%c0_32, %c0_33, %c0_34], %56 {strides = array<i32>} : memref<1x32x128xf32, #tpu.memory_space<vmem>>, vector<1x32x128xf32>,
    return
  }
  func.func @transform_0(%arg0: i32) -> (i32, i32, i32) {
    %c0_i32 = arith.constant 0 : i32
    %c0_i32_0 = arith.constant 0 : i32
    %c0_i32_1 = arith.constant 0 : i32
    return %arg0, %c0_i32, %c0_i32_0 : i32, i32, i32
  }
  func.func @transform_1(%arg0: i32) -> (i32, i32, i32) {
    %c0_i32 = arith.constant 0 : i32
    %c0_i32_0 = arith.constant 0 : i32
    %c0_i32_1 = arith.constant 0 : i32
    return %arg0, %c0_i32, %c0_i32_0 : i32, i32, i32
  }
  func.func @transform_2(%arg0: i32) -> (i32, i32, i32) {
    %c0_i32 = arith.constant 0 : i32
    %c0_i32_0 = arith.constant 0 : i32
    %c0_i32_1 = arith.constant 0 : i32
    return %arg0, %c0_i32, %c0_i32_0 : i32, i32, i32
  }
  func.func @transform_3(%arg0: i32) -> (i32, i32) {
    %c0_i32 = arith.constant 0 : i32
    %c0_i32_0 = arith.constant 0 : i32
    %c0_i32_1 = arith.constant 0 : i32
    return %c0_i32, %c0_i32_0 : i32, i32
  }
  func.func @transform_4(%arg0: i32) -> (i32, i32, i32) {
    %c0_i32 = arith.constant 0 : i32
    %c0_i32_0 = arith.constant 0 : i32
    %c0_i32_1 = arith.constant 0 : i32
    return %arg0, %c0_i32, %c0_i32_0 : i32, i32, i32
  }
}

</mosaic_0001>

<bundles_post_ra>
// kernel: tpu_custom_call.1
= control target key start
LH: loop header
LB: loop body
LE: loop exit
PB: predicated region body
PF: predicated region fallthrough
CT: control target
= control target key end

     0   :  { %9 = vsyncpa [#allocation3], 0  ;;  %s4577_s0 = inlined_call_operand.vmem [shape: f32[4,256,8], index: 0, kind: input, shape index: {}]   ;;  %s4578_s1 = inlined_call_operand.vmem [shape: bf16[4,256,256], index: 1, kind: input, shape index: {}]   ;;  %s4579_s2 = inlined_call_operand.hbm [shape: bf16[4,32,256], index: 2, kind: input, shape index: {}]   ;;  %s4580_s3 = inlined_call_operand.hbm [shape: f32[96,128], index: 3, kind: input, shape index: {}]   ;;  %s4581_s4 = inlined_call_operand.hbm [shape: f32[4,32,128], index: 4, kind: output, shape index: {}]  }
   0x1   :  { %11 = vsyncpa [#allocation3 + $0x1], 0 }
   0x2   :  { %12 = vsyncpa [#allocation6], 0 }
   0x3   :  { %13 = vsyncpa [#allocation4], 0 }
   0x4   :  { %15 = vsyncpa [#allocation4 + $0x1], 0  ;;  %s3587_s15 = smov 0   ;;  %s3589_s16 = smov 0  }
   0x5   :  { %s3591_s17 = smov 0   ;;  %s3593_s18 = smov 0  }
   0x6 LB: > { %s3608_s19 = sadd.s32 4294967295, %s3552_s18   ;;  %s2654_s20 = sadd.s32 4294967294, %s3552_s18   ;;  %s3552_s18 = sphi %s3593_s18, %s4696_s18   ;;  %s3548_s17 = sphi %s3591_s17, %s4695_s17   ;;  %s3544_s16 = sphi %s3589_s16, %s4694_s16   ;;  %s3540_s15 = sphi %s3587_s15, %s4693_s15  }
   0x7   : > { %p93_p0 = scmp.ne.s32.totalorder %s3544_s16, %s3540_s15  ;;  %p4582_p1 = scmp.eq.s32.totalorder %s3608_s19, 0 }
   0x8   : > { %p144_p3 = scmp.eq.s32.totalorder %s2654_s20, 3  ;;  %p2655_p5 = scmp.ge.s32.totalorder %s3552_s18, 1 }
   0x9   : > { %p3617_p4 = por %p4582_p1, %p93_p0  ;;  %p151_p7 = scmp.lt.s32.totalorder %s3552_s18, 5 }
   0xa   : > { %p3622_p6 = por %p144_p3, %p93_p0  ;;  %s3554_s24 = smov [#allocation5]  }
   0xb   : > { %s4633_s21 = scalar_select %p3617_p4, 1, 0 }
   0xc   : > { %s4634_s22 = scalar_select %p3622_p6, 1, 0 }
   0xd   : > { %p3627_p8 = pnand %p2655_p5, %p151_p7  ;;  %s163_s25 = sshll.u32 %s3554_s24, 4  ;;  %s164_s25 = int_to_ptr.vmem [resolvable:$true] %s163_s25 }
   0xe   : > { %s3640_s27 = sadd.s32 1, %s3552_s18   ;;  %s80_s28 = sadd.s32 1, %s3548_s17 }
   0xf   : > { %s4635_s23 = scalar_select %p3627_p8, 1, 0 }
  0x10   : > { %p3354_p9 = pneg %p3627_p8  ;;  %s77_s29 = ssub.s32 %s3552_s18, %s3640_s27 }
  0x11   : > { %s3424_s6 = scalar_lea.hbm %s4580_s3, 1536 }
  0x12   : > { %p3635_p10 = pnand %p3354_p9, %p4582_p1  ;;  %p3425_p11 = scmp.ne.s32.totalorder %s4580_s3, %s3424_s6 }
  0x13   : > { %p3431_p3 = scmp.lt.u32.totalorder %s3424_s6, %s4580_s3 }
  0x14   : > { %p3426_p12 = pneg %p3635_p10 }
  0x16   : > { %p3427_p13 = pnand %p3426_p12, %p3425_p11 }
  0x18   : > { %p3428_p0 = pneg %p3427_p13 }
  0x1a   : > { %p3433_p5 = pnand %p3431_p3, %p3428_p0 }
  0x1c   : > { %3436 = shalt.err (!%p3433_p5)
}
  0x1d   : > { %s3437_s11 = scalar_lea.vmem %s164_s25, 1536  ;;  %p3445_p2 = scmp.lt.s32.totalorder %s164_s25, %s164_s25 }
  0x1e   : > { %p3438_p7 = scmp.ne.s32.totalorder %s164_s25, %s3437_s11  ;;  %p3446_p6 = scmp.lt.s32.totalorder %s3437_s11, %s3437_s11 }
  0x20   : > { %p3440_p9 = pnand %p3438_p7, %p3426_p12  ;;  %p3447_p4 = por %p3446_p6, %p3445_p2 }
  0x22   : > { %p3441_p1 = pneg %p3440_p9 }
  0x24   : > { %p3448_p8 = pnand %p3447_p4, %p3441_p1 }
  0x26   : > { %3451 = shalt.err (!%p3448_p8)
}
  0x27   : > { %s3555_s12 = smov 128   ;;  %s3556_s13 = smov 8  }
  0x28   : > { %3357 = dma.hbm_to_vmem [thread:$0]  (!%p3635_p10), %s4580_s3, 1536, %s164_s25, [#allocation6], %s3555_s12, %s3555_s12, %s3556_s13  }
  0x29   : > { %p78_p1 = scmp.eq.s32.totalorder %s77_s29, 0  ;;  %p87_p2 = scmp.ne.s32.totalorder %s3548_s17, %s3544_s16 }
  0x2a   : > { %p88_p4 = scmp.eq.s32.totalorder %s3552_s18, 0  ;;  %p3367_p6 = scmp.lt.s32.totalorder %s3552_s18, 4 }
  0x2b   : > { %s3669_s24 = scalar_select %p78_p1, %s3548_s17, %s80_s28  }
  0x2c   : > { %p89_p8 = por %p88_p4, %p87_p2  ;;  %p4637_p11 = scmp.eq.s32.totalorder %s3608_s19, 3 }
  0x2d   : > { %s193_s26 = sand.u32 1, %s3548_s17   ;;  %s2811_s5 = sshll.u32 %s3552_s18, 9 }
  0x2e   : > { %p3673_p12 = por %p4637_p11, %p87_p2  ;;  %s2658_s6 = sshll.u32 %s193_s26, 5 }
  0x2f   : > { %s3682_s9 = scalar_lea.hbm %s4579_s2, %s2811_s5  ;;  %s197_s25 = scalar_lea.vmem [#allocation2], %s2658_s6 }
  0x30   : > { %s204_s28 = sshll.u32 %s197_s25, 4  ;;  %p3684_p10 = pnand %p3367_p6, %p89_p8  ;;  %s3688_s28 = int_to_ptr.vmem [resolvable:$true] %s204_s28 }
  0x31   : > { %s3690_s10 = scalar_lea.sflag [#allocation3], %s193_s26  ;;  %s3452_s11 = scalar_lea.hbm %s3682_s9, 512 }
  0x32   : > { %p3453_p13 = scmp.ne.s32.totalorder %s3682_s9, %s3452_s11  ;;  %p3454_p0 = pneg %p3684_p10 }
  0x33   : > { %s3457_s5 = scalar_lea.hbm %s4579_s2, 2048  ;;  %p3458_p7 = scmp.lt.u32.totalorder %s3682_s9, %s4579_s2 }
  0x34   : > { %p3455_p3 = pnand %p3454_p0, %p3453_p13  ;;  %p3459_p9 = scmp.lt.u32.totalorder %s3457_s5, %s3452_s11 }
  0x35   : > { %p3461_p2 = scmp.lt.u32.totalorder %s3452_s11, %s3682_s9 }
  0x36   : > { %p3456_p5 = pneg %p3455_p3  ;;  %p3460_p1 = por %p3459_p9, %p3458_p7 }
  0x38   : > { %p3462_p4 = por %p3461_p2, %p3460_p1 }
  0x3a   : > { %p3463_p6 = pnand %p3462_p4, %p3456_p5 }
  0x3c   : > { %3466 = shalt.err (!%p3463_p6)
}
  0x3d   : > { %s3467_s26 = scalar_lea.vmem %s3688_s28, 512  ;;  %s3557_s8 = smov [#allocation2]  }
  0x3e   : > { %p3468_p8 = scmp.ne.s32.totalorder %s3688_s28, %s3467_s26  ;;  %s3472_s25 = sshll.u32 %s3557_s8, 4  ;;  %s3473_s25 = int_to_ptr.vmem [resolvable:$false] %s3472_s25 }
  0x3f   : > { %s3474_s14 = scalar_lea.vmem %s3473_s25, 1024  ;;  %p3475_p3 = scmp.lt.s32.totalorder %s3688_s28, %s3473_s25 }
  0x40   : > { %p3470_p11 = pnand %p3468_p8, %p3454_p0  ;;  %p3476_p7 = scmp.lt.s32.totalorder %s3474_s14, %s3467_s26 }
  0x42   : > { %p3471_p13 = pneg %p3470_p11  ;;  %p3477_p9 = por %p3476_p7, %p3475_p3 }
  0x44   : > { %p3478_p1 = pnand %p3477_p9, %p3471_p13 }
  0x46   : > { %3481 = shalt.err (!%p3478_p1)
}
  0x47   : > { %3361 = dma.hbm_to_vmem [thread:$0]  (!%p3684_p10), %s3682_s9, 512, %s3688_s28, %s3690_s10, %s3555_s12, %s3555_s12, %s3556_s13  }
  0x48   : > { %p4640_p0 = scmp.ne.s32.totalorder %s4635_s23, 0 }
  0x49   : > { %s3724_s11 = sand.u32 (!%p4640_p0), 1, %s3544_s16   ;;  %p4641_p5 = scmp.ne.s32.totalorder (!%p4640_p0), %s4633_s21, 0 }
  0x4a   : > { %216 = sbr.rel (%p4640_p0) target bundleno = 2485 (0x9b5), region = 36  ;;  %s2662_s20 = sshll.u32 (!%p4640_p0), %s3724_s11, 5 }
  0x4b   : > { %s219_s5 = scalar_lea.sflag (!%p4640_p0), [#allocation3], %s3724_s11  ;;  %s3730_s29 = scalar_lea.vmem (!%p4640_p0), [#allocation2], %s2662_s20 }
  0x51   : > { %3527 = dma.done.wait (%p4641_p5), %s219_s5, 512  }
  0x52   : > { %3529 = vsyncadd (%p4641_p5), %s219_s5, 4294966784  ;;  %p4642_p10 = scmp.eq.s32.totalorder %s3608_s19, 0 }
  0x54   : > { %3531 = dma.done.wait (%p4642_p10), [#allocation6], 1536   ;;  %p4643_p2 = pmov %p4642_p10 }
  0x55   : > { %p261_p4 = scmp.lt.s32.totalorder %s3608_s19, 3  ;;  %v3558_v0 = vmov 0.0|0.0   ;;  %vm652_vm0 = vcmask 64512   ;;  %vm1010_vm1 = vcmask 130048   ;;  %s260_s7 = scalar_lea.vmem [#allocation7], %s2662_s20 }
  0x56   : > { %3533 = vsyncadd (%p4643_p2), [#allocation6], 4294965760  ;;  %3210 = vmatprep.subr.bf16.mxu0 %v3558_v0  ;;  %s2547_s26 = sshll.u32 %s260_s7, 4  ;;  %s2814_s8 = sshll.u32 %s3608_s19, 9  ;;  %s4529_s26 = int_to_ptr.vmem [resolvable:$true] %s2547_s26 }
  0x57   : > { %s262_s23 = scalar_select %p261_p4, %s3608_s19, 3 }
  0x58   : > { %s4534_s20 = scalar_lea.hbm %s4581_s4, %s2814_s8  ;;  %s2534_s5 = scalar_lea.sflag [#allocation4], %s3724_s11 }
  0x59   : > { %s2812_s12 = sshll.u32 %s262_s23, 8  ;;  %s3559_s19 = smov [#allocation7]  }
  0x5a   : > { %s3746_s28 = scalar_lea.vmem %s4577_s0, %s2812_s12  ;;  %s3758_s6 = scalar_lea.vmem %s4578_s1, %s2812_s12 }
  0x5b   : > { %v283_v1 = vld [vmem:[%s3746_s28] sm:$0xff]  ;;  %v284_v2 = vld [vmem:[%s3746_s28 + $0x8] sm:$0xff]  ;;  %v285_v3 = vld [vmem:[%s3746_s28 + $0x10] sm:$0xff]  ;;  %s3486_s23 = sshll.u32 %s3559_s19, 4  ;;  %s3487_s23 = int_to_ptr.vmem [resolvable:$false] %s3486_s23 }
  0x5c   : > { %v3211_v4 = vpack.c.bf16 %v284_v2, %v283_v1  ;;  %v286_v5 = vld [vmem:[%s3746_s28 + $0x18] sm:$0xff]  ;;  %v287_v7 = vld [vmem:[%s3746_s28 + $0x20] sm:$0xff]  ;;  %v288_v8 = vld [vmem:[%s3746_s28 + $0x28] sm:$0xff]  ;;  %s3488_s12 = scalar_lea.vmem %s3487_s23, 1024  ;;  %p3489_p13 = scmp.lt.s32.totalorder %s4529_s26, %s3487_s23 }
  0x5d   : > { %v3214_v6 = vpack.c.bf16 %v286_v5, %v285_v3  ;;  %v3217_v9 = vpack.c.bf16 %v288_v8, %v287_v7  ;;  %v289_v10 = vld [vmem:[%s3746_s28 + $0x30] sm:$0xff]  ;;  %v290_v11 = vld [vmem:[%s3746_s28 + $0x38] sm:$0xff]  ;;  %v3764_v12 = vld [vmem:[%s3758_s6] sm:$0xff] }
  0x5e   : > { %3212 = vmatpush1.bf16.msra.mxu0 %v3211_v4  ;;  %v3220_v13 = vpack.c.bf16 %v290_v11, %v289_v10  ;;  %v348_v14 = vunpack.c.h.bf16 %v3764_v12  ;;  %v291_v15 = vld [vmem:[%s3746_s28 + $0x40] sm:$0xff]  ;;  %v292_v16 = vld [vmem:[%s3746_s28 + $0x48] sm:$0xff]  ;;  %v293_v18 = vld [vmem:[%s3746_s28 + $0x50] sm:$0xff]  ;;  %v347_v52 = vunpack.c.l.bf16 %v3764_v12 }
  0x5f   : > { %3213 = vmatprep.subr.bf16.mxu0 %v3558_v0  ;;  %v3223_v17 = vpack.c.bf16 %v292_v16, %v291_v15  ;;  %v294_v19 = vld [vmem:[%s3746_s28 + $0x58] sm:$0xff]  ;;  %v295_v21 = vld [vmem:[%s3746_s28 + $0x60] sm:$0xff]  ;;  %v296_v22 = vld [vmem:[%s3746_s28 + $0x68] sm:$0xff] }
  0x60   : > { %487 = vmatprep.mubr.f32.mxu0 %v348_v14  ;;  %v3226_v20 = vpack.c.bf16 %v294_v19, %v293_v18  ;;  %v3229_v23 = vpack.c.bf16 %v296_v22, %v295_v21  ;;  %v297_v24 = vld [vmem:[%s3746_s28 + $0x70] sm:$0xff]  ;;  %v298_v25 = vld [vmem:[%s3746_s28 + $0x78] sm:$0xff]  ;;  %v299_v27 = vld [vmem:[%s3746_s28 + $0x80] sm:$0xff] }
  0x61   : > { %v3232_v26 = vpack.c.bf16 %v298_v25, %v297_v24  ;;  %v300_v28 = vld [vmem:[%s3746_s28 + $0x88] sm:$0xff]  ;;  %v301_v30 = vld [vmem:[%s3746_s28 + $0x90] sm:$0xff]  ;;  %v302_v31 = vld [vmem:[%s3746_s28 + $0x98] sm:$0xff] }
  0x62   : > { %3215 = vmatpush1.bf16.msra.mxu0 %v3214_v6  ;;  %v3235_v29 = vpack.c.bf16 %v300_v28, %v299_v27  ;;  %v3238_v32 = vpack.c.bf16 %v302_v31, %v301_v30  ;;  %v303_v33 = vld [vmem:[%s3746_s28 + $0xa0] sm:$0xff]  ;;  %v304_v34 = vld [vmem:[%s3746_s28 + $0xa8] sm:$0xff]  ;;  %v305_v36 = vld [vmem:[%s3746_s28 + $0xb0] sm:$0xff] }
  0x63   : > { %3216 = vmatprep.subr.bf16.mxu0 %v3558_v0  ;;  %v3241_v35 = vpack.c.bf16 %v304_v34, %v303_v33  ;;  %v306_v37 = vld [vmem:[%s3746_s28 + $0xb8] sm:$0xff]  ;;  %v307_v39 = vld [vmem:[%s3746_s28 + $0xc0] sm:$0xff]  ;;  %v308_v40 = vld [vmem:[%s3746_s28 + $0xc8] sm:$0xff] }
  0x64   : > { %v3244_v38 = vpack.c.bf16 %v306_v37, %v305_v36  ;;  %v3247_v41 = vpack.c.bf16 %v308_v40, %v307_v39  ;;  %v309_v42 = vld [vmem:[%s3746_s28 + $0xd0] sm:$0xff]  ;;  %v310_v43 = vld [vmem:[%s3746_s28 + $0xd8] sm:$0xff]  ;;  %v311_v45 = vld [vmem:[%s3746_s28 + $0xe0] sm:$0xff] }
  0x65   : > { %v3250_v44 = vpack.c.bf16 %v310_v43, %v309_v42  ;;  %v312_v46 = vld [vmem:[%s3746_s28 + $0xe8] sm:$0xff]  ;;  %v313_v48 = vld [vmem:[%s3746_s28 + $0xf0] sm:$0xff]  ;;  %v314_v49 = vld [vmem:[%s3746_s28 + $0xf8] sm:$0xff] }
  0x66   : > { %3218 = vmatpush1.bf16.msra.mxu0 %v3217_v9  ;;  %v3253_v47 = vpack.c.bf16 %v312_v46, %v311_v45  ;;  %v3256_v50 = vpack.c.bf16 %v314_v49, %v313_v48  ;;  %v3807_v51 = vld [vmem:[%s3758_s6 + $0x8] sm:$0xff]  ;;  %v3812_v54 = vld [vmem:[%s3758_s6 + $0x10] sm:$0xff]  ;;  %v3821_v57 = vld [vmem:[%s3758_s6 + $0x18] sm:$0xff] }
  0x67   : > { %3219 = vmatprep.subr.bf16.mxu0 %v3558_v0  ;;  %v350_v53 = vunpack.c.h.bf16 %v3807_v51  ;;  %v349_v55 = vunpack.c.l.bf16 %v3807_v51  ;;  %v352_v56 = vunpack.c.h.bf16 %v3812_v54  ;;  %v351_v58 = vunpack.c.l.bf16 %v3812_v54  ;;  %v3830_v60 = vld [vmem:[%s3758_s6 + $0x20] sm:$0xff]  ;;  %v3839_v63 = vld [vmem:[%s3758_s6 + $0x28] sm:$0xff]  ;;  %v3848_v3 = vld [vmem:[%s3758_s6 + $0x30] sm:$0xff] }
  0x68   : > { %v354_v59 = vunpack.c.h.bf16 %v3821_v57  ;;  %v353_v61 = vunpack.c.l.bf16 %v3821_v57  ;;  %v356_v62 = vunpack.c.h.bf16 %v3830_v60  ;;  %v355_v1 = vunpack.c.l.bf16 %v3830_v60  ;;  %v3857_v6 = vld [vmem:[%s3758_s6 + $0x38] sm:$0xff]  ;;  %v3866_v9 = vld [vmem:[%s3758_s6 + $0x40] sm:$0xff] }
  0x69   : > { %v358_v2 = vunpack.c.h.bf16 %v3839_v63  ;;  %v357_v4 = vunpack.c.l.bf16 %v3839_v63  ;;  %v360_v5 = vunpack.c.h.bf16 %v3848_v3  ;;  %v359_v7 = vunpack.c.l.bf16 %v3848_v3 }
  0x6a   : > { %3221 = vmatpush1.bf16.msra.mxu0 %v3220_v13  ;;  %v362_v8 = vunpack.c.h.bf16 %v3857_v6  ;;  %v361_v10 = vunpack.c.l.bf16 %v3857_v6  ;;  %v4632_v11 = vunpack.c.h.bf16 %v3866_v9  ;;  %v3875_v13 = vld [vmem:[%s3758_s6 + $0x48] sm:$0xff]  ;;  %v4631_v15 = vunpack.c.l.bf16 %v3866_v9 }
  0x6b   : > { %3222 = vmatprep.subr.bf16.mxu0 %v3558_v0  ;;  %v4630_v16 = vunpack.c.h.bf16 %v3875_v13  ;;  %v4629_v18 = vunpack.c.l.bf16 %v3875_v13  ;;  %v4645_v12 = vunpack.c.l.bf16 %v3866_v9  ;;  %v4646_v51 = vunpack.c.h.bf16 %v3875_v13 }
  0x6e   : > { %3224 = vmatpush1.bf16.msra.mxu0 %v3223_v17  ;;  %v3884_v17 = vld [vmem:[%s3758_s6 + $0x50] sm:$0xff] }
  0x6f   : > { %3225 = vmatprep.subr.bf16.mxu0 %v3558_v0  ;;  %v4627_v19 = vunpack.c.h.bf16 %v3884_v17  ;;  %v4625_v21 = vunpack.c.l.bf16 %v3884_v17  ;;  %v4649_v54 = vunpack.c.l.bf16 %v3884_v17 }
  0x72   : > { %3227 = vmatpush1.bf16.msra.mxu0 %v3226_v20  ;;  %v3893_v20 = vld [vmem:[%s3758_s6 + $0x58] sm:$0xff] }
  0x73   : > { %3228 = vmatprep.subr.bf16.mxu0 %v3558_v0  ;;  %v4623_v22 = vunpack.c.h.bf16 %v3893_v20  ;;  %v4622_v24 = vunpack.c.l.bf16 %v3893_v20 }
  0x76   : > { %3230 = vmatpush1.bf16.msra.mxu0 %v3229_v23  ;;  %v3902_v23 = vld [vmem:[%s3758_s6 + $0x60] sm:$0xff] }
  0x77   : > { %3231 = vmatprep.subr.bf16.mxu0 %v3558_v0  ;;  %v4620_v25 = vunpack.c.h.bf16 %v3902_v23  ;;  %v4616_v27 = vunpack.c.l.bf16 %v3902_v23  ;;  %v4652_v57 = vunpack.c.h.bf16 %v3902_v23 }
  0x7a   : > { %3233 = vmatpush1.bf16.msra.mxu0 %v3232_v26  ;;  %v3911_v26 = vld [vmem:[%s3758_s6 + $0x68] sm:$0xff] }
  0x7b   : > { %3234 = vmatprep.subr.bf16.mxu0 %v3558_v0  ;;  %v4613_v28 = vunpack.c.h.bf16 %v3911_v26  ;;  %v4610_v30 = vunpack.c.l.bf16 %v3911_v26  ;;  %v4655_v60 = vunpack.c.l.bf16 %v3911_v26 }
  0x7e   : > { %3236 = vmatpush1.bf16.msra.mxu0 %v3235_v29  ;;  %v3920_v29 = vld [vmem:[%s3758_s6 + $0x70] sm:$0xff] }
  0x7f   : > { %3237 = vmatprep.subr.bf16.mxu0 %v3558_v0  ;;  %v4608_v31 = vunpack.c.h.bf16 %v3920_v29  ;;  %v4605_v33 = vunpack.c.l.bf16 %v3920_v29 }
  0x82   : > { %3239 = vmatpush1.bf16.msra.mxu0 %v3238_v32  ;;  %v3929_v32 = vld [vmem:[%s3758_s6 + $0x78] sm:$0xff] }
  0x83   : > { %3240 = vmatprep.subr.bf16.mxu0 %v3558_v0  ;;  %v4602_v34 = vunpack.c.h.bf16 %v3929_v32  ;;  %v4597_v36 = vunpack.c.l.bf16 %v3929_v32  ;;  %v4658_v63 = vunpack.c.h.bf16 %v3929_v32 }
  0x86   : > { %3242 = vmatpush1.bf16.msra.mxu0 %v3241_v35  ;;  %v3938_v35 = vld [vmem:[%s3758_s6 + $0x80] sm:$0xff] }
  0x87   : > { %3243 = vmatprep.subr.bf16.mxu0 %v3558_v0  ;;  %v4594_v37 = vunpack.c.h.bf16 %v3938_v35  ;;  %v4592_v39 = vunpack.c.l.bf16 %v3938_v35  ;;  %v4661_v3 = vunpack.c.l.bf16 %v3938_v35 }
  0x8a   : > { %3245 = vmatpush1.bf16.msra.mxu0 %v3244_v38  ;;  %v3947_v38 = vld [vmem:[%s3758_s6 + $0x88] sm:$0xff] }
  0x8b   : > { %3246 = vmatprep.subr.bf16.mxu0 %v3558_v0  ;;  %v4590_v40 = vunpack.c.h.bf16 %v3947_v38  ;;  %v4587_v42 = vunpack.c.l.bf16 %v3947_v38 }
  0x8e   : > { %3248 = vmatpush1.bf16.msra.mxu0 %v3247_v41  ;;  %v3956_v41 = vld [vmem:[%s3758_s6 + $0x90] sm:$0xff] }
  0x8f   : > { %3249 = vmatprep.subr.bf16.mxu0 %v3558_v0  ;;  %v4585_v43 = vunpack.c.h.bf16 %v3956_v41  ;;  %v4586_v45 = vunpack.c.l.bf16 %v3956_v41  ;;  %v4664_v6 = vunpack.c.h.bf16 %v3956_v41 }
  0x92   : > { %3251 = vmatpush1.bf16.msra.mxu0 %v3250_v44  ;;  %v3965_v44 = vld [vmem:[%s3758_s6 + $0x98] sm:$0xff] }
  0x93   : > { %3252 = vmatprep.subr.bf16.mxu0 %v3558_v0  ;;  %v4588_v46 = vunpack.c.h.bf16 %v3965_v44  ;;  %v4589_v48 = vunpack.c.l.bf16 %v3965_v44 }
  0x96   : > { %3254 = vmatpush1.bf16.msra.mxu0 %v3253_v47  ;;  %v3974_v47 = vld [vmem:[%s3758_s6 + $0xa0] sm:$0xff] }
  0x97   : > { %3255 = vmatprep.subr.bf16.mxu0 %v3558_v0  ;;  %v4591_v49 = vunpack.c.h.bf16 %v3974_v47 }
  0x9a   : > { %3257 = vmatpush1.bf16.msra.mxu0 %v3256_v50  ;;  %v3983_v50 = vld [vmem:[%s3758_s6 + $0xa8] sm:$0xff] }
  0x9d   : > { %488 = vmatmul.mubr.f32.vlgmr.msra.gmra.mrb[0].mxu0 %v347_v52 }
  0x9e   : > { %492 = vmatprep.mubr.f32.mxu0 %v350_v53 }
  0xa1   : > { %493 = vmatmul.mubr.f32.gmra.mrb[2].mxu0 %v349_v55 }
  0xa2   : > { %497 = vmatprep.mubr.f32.mxu0 %v352_v56 }
  0xa5   : > { %498 = vmatmul.mubr.f32.gmra.mrb[4].mxu0 %v351_v58 }
  0xa6   : > { %502 = vmatprep.mubr.f32.mxu0 %v354_v59 }
  0xa9   : > { %503 = vmatmul.mubr.f32.gmra.mrb[6].mxu0 %v353_v61 }
  0xaa   : > { %507 = vmatprep.mubr.f32.mxu0 %v356_v62 }
  0xad   : > { %508 = vmatmul.mubr.f32.gmra.mrb[8].mxu0 %v355_v1 }
  0xae   : > { %512 = vmatprep.mubr.f32.mxu0 %v358_v2 }
  0xb1   : > { %513 = vmatmul.mubr.f32.gmra.mrb[10].mxu0 %v357_v4 }
  0xb2   : > { %517 = vmatprep.mubr.f32.mxu0 %v360_v5 }
  0xb5   : > { %518 = vmatmul.mubr.f32.gmra.mrb[12].mxu0 %v359_v7 }
  0xb6   : > { %522 = vmatprep.mubr.f32.mxu0 %v362_v8 }
  0xb9   : > { %523 = vmatmul.mubr.f32.gmra.mrb[14].mxu0 %v361_v10 }
  0xba   : > { %527 = vmatprep.mubr.f32.mxu0 %v4632_v11 }
  0xbd   : > { %528 = vmatmul.mubr.f32.gmra.mrb[16].mxu0 %v4631_v15 }
  0xbe   : > { %532 = vmatprep.mubr.f32.mxu0 %v4630_v16 }
  0xc1   : > { %533 = vmatmul.mubr.f32.gmra.mrb[18].mxu0 %v4629_v18  ;;  %v274_v18 = vld [vmem:[#allocation5 + $0x18] sm:$0xff] }
  0xc2   : > { %537 = vmatprep.mubr.f32.mxu0 %v4627_v19 }
  0xc5   : > { %538 = vmatmul.mubr.f32.gmra.mrb[20].mxu0 %v4625_v21 }
  0xc6   : > { %542 = vmatprep.mubr.f32.mxu0 %v4623_v22 }
  0xc9   : > { %543 = vmatmul.mubr.f32.gmra.mrb[22].mxu0 %v4622_v24 }
  0xca   : > { %547 = vmatprep.mubr.f32.mxu0 %v4620_v25 }
  0xcd   : > { %548 = vmatmul.mubr.f32.gmra.mrb[24].mxu0 %v4616_v27 }
  0xce   : > { %552 = vmatprep.mubr.f32.mxu0 %v4613_v28 }
  0xd1   : > { %553 = vmatmul.mubr.f32.gmra.mrb[26].mxu0 %v4610_v30 }
  0xd2   : > { %557 = vmatprep.mubr.f32.mxu0 %v4608_v31  ;;  %v4055_v31 = vld [vmem:[%s3758_s6 + $0xe8] sm:$0xff] }
  0xd3   : > { %v4619_v30 = vunpack.c.h.bf16 %v4055_v31 }
  0xd5   : > { %558 = vmatmul.mubr.f32.gmra.mrb[28].mxu0 %v4605_v33  ;;  %v4046_v33 = vld [vmem:[%s3758_s6 + $0xe0] sm:$0xff] }
  0xd6   : > { %562 = vmatprep.mubr.f32.mxu0 %v4602_v34  ;;  %v4037_v34 = vld [vmem:[%s3758_s6 + $0xd8] sm:$0xff] }
  0xd9   : > { %563 = vmatmul.mubr.f32.gmra.mrb[30].mxu0 %v4597_v36  ;;  %v4019_v36 = vld [vmem:[%s3758_s6 + $0xc8] sm:$0xff] }
  0xda   : > { %567 = vmatprep.mubr.f32.mxu0 %v4594_v37  ;;  %v4010_v37 = vld [vmem:[%s3758_s6 + $0xc0] sm:$0xff] }
  0xdd   : > { %568 = vmatmul.mubr.f32.gmra.mrb[32].mxu0 %v4592_v39  ;;  %v271_v39 = vld [vmem:[#allocation5] sm:$0xff] }
  0xde   : > { %572 = vmatprep.mubr.f32.mxu0 %v4590_v40  ;;  %v4001_v40 = vld [vmem:[%s3758_s6 + $0xb8] sm:$0xff]  ;;  %2998 = vmatprep.subr.mxu1 %v271_v39 }
  0xdf   : > { %2999 = vmatpush3.msra.mxu1 %v271_v39  ;;  %v4606_v39 = vunpack.c.h.bf16 %v4019_v36 }
  0xe1   : > { %573 = vmatmul.mubr.f32.gmra.mrb[34].mxu0 %v4587_v42  ;;  %v3992_v42 = vld [vmem:[%s3758_s6 + $0xb0] sm:$0xff] }
  0xe2   : > { %577 = vmatprep.mubr.f32.mxu0 %v4585_v43  ;;  %v4593_v43 = vunpack.c.l.bf16 %v3974_v47 }
  0xe5   : > { %578 = vmatmul.mubr.f32.gmra.mrb[36].mxu0 %v4586_v45  ;;  %v4595_v45 = vunpack.c.h.bf16 %v3983_v50 }
  0xe6   : > { %582 = vmatprep.mubr.f32.mxu0 %v4588_v46  ;;  %v4596_v46 = vunpack.c.l.bf16 %v3983_v50 }
  0xe9   : > { %583 = vmatmul.mubr.f32.gmra.mrb[38].mxu0 %v4589_v48  ;;  %v4598_v48 = vunpack.c.h.bf16 %v3992_v42 }
  0xea   : > { %587 = vmatprep.mubr.f32.mxu0 %v4591_v49  ;;  %v4599_v49 = vunpack.c.l.bf16 %v3992_v42 }
  0xed   : > { %588 = vmatmul.mubr.f32.gmra.mrb[40].mxu0 %v4593_v43  ;;  %v4600_v43 = vunpack.c.h.bf16 %v4001_v40 }
  0xee   : > { %592 = vmatprep.mubr.f32.mxu0 %v4595_v45  ;;  %v4601_v45 = vunpack.c.l.bf16 %v4001_v40 }
  0xf1   : > { %593 = vmatmul.mubr.f32.gmra.mrb[42].mxu0 %v4596_v46  ;;  %v4603_v46 = vunpack.c.h.bf16 %v4010_v37 }
  0xf2   : > { %597 = vmatprep.mubr.f32.mxu0 %v4598_v48  ;;  %v4604_v48 = vunpack.c.l.bf16 %v4010_v37 }
  0xf5   : > { %598 = vmatmul.mubr.f32.gmra.mrb[44].mxu0 %v4599_v49  ;;  %v4028_v49 = vld [vmem:[%s3758_s6 + $0xd0] sm:$0xff] }
  0xf6   : > { %602 = vmatprep.mubr.f32.mxu0 %v4600_v43  ;;  %v4607_v43 = vunpack.c.l.bf16 %v4019_v36 }
  0xf9   : > { %603 = vmatmul.mubr.f32.gmra.mrb[46].mxu0 %v4601_v45  ;;  %v4609_v45 = vunpack.c.h.bf16 %v4028_v49 }
  0xfa   : > { %607 = vmatprep.mubr.f32.mxu0 %v4603_v46  ;;  %v4611_v46 = vunpack.c.l.bf16 %v4028_v49 }
  0xfd   : > { %608 = vmatmul.mubr.f32.gmra.mrb[48].mxu0 %v4604_v48  ;;  %v4612_v48 = vunpack.c.h.bf16 %v4037_v34 }
  0xfe   : > { %612 = vmatprep.mubr.f32.mxu0 %v4606_v39  ;;  %v4614_v39 = vunpack.c.l.bf16 %v4037_v34 }
 0x101   : > { %613 = vmatmul.mubr.f32.gmra.mrb[50].mxu0 %v4607_v43  ;;  %v4615_v43 = vunpack.c.h.bf16 %v4046_v33 }
 0x102   : > { %617 = vmatprep.mubr.f32.mxu0 %v4609_v45  ;;  %v4617_v45 = vunpack.c.l.bf16 %v4046_v33 }
 0x105   : > { %618 = vmatmul.mubr.f32.gmra.mrb[52].mxu0 %v4611_v46  ;;  %v4064_v46 = vld [vmem:[%s3758_s6 + $0xf0] sm:$0xff] }
 0x106   : > { %622 = vmatprep.mubr.f32.mxu0 %v4612_v48  ;;  %v4618_v48 = vunpack.c.l.bf16 %v4055_v31  ;;  %v4621_v28 = vunpack.c.h.bf16 %v4064_v46 }
 0x109   : > { %623 = vmatmul.mubr.f32.gmra.mrb[54].mxu0 %v4614_v39  ;;  %v4073_v39 = vld [vmem:[%s3758_s6 + $0xf8] sm:$0xff] }
 0x10a   : > { %627 = vmatprep.mubr.f32.mxu0 %v4615_v43  ;;  %v4624_v43 = vunpack.c.l.bf16 %v4064_v46  ;;  %v4626_v27 = vunpack.c.h.bf16 %v4073_v39 }
 0x10d   : > { %628 = vmatmul.mubr.f32.gmra.mrb[56].mxu0 %v4617_v45  ;;  %v4628_v45 = vunpack.c.l.bf16 %v4073_v39 }
 0x10e   : > { %632 = vmatprep.mubr.f32.mxu0 %v4619_v30 }
 0x111   : > { %633 = vmatmul.mubr.f32.gmra.mrb[58].mxu0 %v4618_v48 }
 0x112   : > { %637 = vmatprep.mubr.f32.mxu0 %v4621_v28 }
 0x115   : > { %638 = vmatmul.mubr.f32.gmra.mrb[60].mxu0 %v4624_v43 }
 0x116   : > { %642 = vmatprep.mubr.f32.mxu0 %v4626_v27 }
 0x119   : > { %643 = vmatmul.mubr.f32.gmra.mrb[62].mxu0 %v4628_v45 }
 0x170   : > { %v489_v48 = vpop.f32.mrb[0].mxu0 }
 0x171   : > { %v491_v30 = vpop.f32.mrb[1].mxu0  ;;  %3000 = vmatprep.mubr.msk.f32.mxu1 %vm652_vm0, %v489_v48 }
 0x174   : > { %v494_v25 = vpop.f32.mrb[2].mxu0 }
 0x175   : > { %v496_v28 = vpop.f32.mrb[3].mxu0  ;;  %3001 = vmatmul.mubr.msk.f32.vlgmr.msra.gmra.mrb[0].mxu1 %vm652_vm0, %v494_v25 }
 0x178   : > { %v499_v24 = vpop.f32.mrb[4].mxu0 }
 0x179   : > { %v501_v22 = vpop.f32.mrb[5].mxu0  ;;  %3003 = vmatprep.mubr.msk.f32.mxu1 %vm652_vm0, %v499_v24 }
 0x17c   : > { %v504_v43 = vpop.f32.mrb[6].mxu0 }
 0x17d   : > { %v506_v21 = vpop.f32.mrb[7].mxu0  ;;  %3004 = vmatmul.mubr.msk.f32.gmra.mrb[2].mxu1 %vm652_vm0, %v504_v43 }
 0x180   : > { %v509_v27 = vpop.f32.mrb[8].mxu0 }
 0x181   : > { %v511_v19 = vpop.f32.mrb[9].mxu0  ;;  %3006 = vmatprep.mubr.msk.f32.mxu1 %vm652_vm0, %v509_v27 }
 0x184   : > { %v514_v45 = vpop.f32.mrb[10].mxu0 }
 0x185   : > { %v516_v30 = vpop.f32.mrb[11].mxu0  ;;  %3007 = vmatmul.mubr.msk.f32.gmra.mrb[4].mxu1 %vm652_vm0, %v514_v45 }
 0x188   : > { %v519_v48 = vpop.f32.mrb[12].mxu0 }
 0x189   : > { %v521_v28 = vpop.f32.mrb[13].mxu0  ;;  %3009 = vmatprep.mubr.msk.f32.mxu1 %vm652_vm0, %v519_v48 }
 0x18c   : > { %v524_v25 = vpop.f32.mrb[14].mxu0 }
 0x18d   : > { %v526_v22 = vpop.f32.mrb[15].mxu0  ;;  %3010 = vmatmul.mubr.msk.f32.gmra.mrb[6].mxu1 %vm652_vm0, %v524_v25 }
 0x190   : > { %v529_v24 = vpop.f32.mrb[16].mxu0 }
 0x191   : > { %v531_v21 = vpop.f32.mrb[17].mxu0  ;;  %3012 = vmatprep.mubr.msk.f32.mxu1 %vm652_vm0, %v529_v24 }
 0x194   : > { %v534_v43 = vpop.f32.mrb[18].mxu0 }
 0x195   : > { %v536_v19 = vpop.f32.mrb[19].mxu0  ;;  %3013 = vmatmul.mubr.msk.f32.gmra.mrb[8].mxu1 %vm652_vm0, %v534_v43 }
 0x198   : > { %v539_v27 = vpop.f32.mrb[20].mxu0 }
 0x199   : > { %v541_v30 = vpop.f32.mrb[21].mxu0  ;;  %3015 = vmatprep.mubr.msk.f32.mxu1 %vm652_vm0, %v539_v27 }
 0x19c   : > { %v544_v45 = vpop.f32.mrb[22].mxu0 }
 0x19d   : > { %v546_v28 = vpop.f32.mrb[23].mxu0  ;;  %3016 = vmatmul.mubr.msk.f32.gmra.mrb[10].mxu1 %vm652_vm0, %v544_v45 }
 0x1a0   : > { %v549_v48 = vpop.f32.mrb[24].mxu0 }
 0x1a1   : > { %v551_v22 = vpop.f32.mrb[25].mxu0  ;;  %3018 = vmatprep.mubr.msk.f32.mxu1 %vm652_vm0, %v549_v48 }
 0x1a4   : > { %v554_v25 = vpop.f32.mrb[26].mxu0 }
 0x1a5   : > { %v556_v21 = vpop.f32.mrb[27].mxu0  ;;  %3019 = vmatmul.mubr.msk.f32.gmra.mrb[12].mxu1 %vm652_vm0, %v554_v25 }
 0x1a8   : > { %v559_v24 = vpop.f32.mrb[28].mxu0 }
 0x1a9   : > { %v561_v19 = vpop.f32.mrb[29].mxu0  ;;  %3021 = vmatprep.mubr.msk.f32.mxu1 %vm652_vm0, %v559_v24 }
 0x1ac   : > { %v564_v43 = vpop.f32.mrb[30].mxu0 }
 0x1ad   : > { %v566_v30 = vpop.f32.mrb[31].mxu0  ;;  %3022 = vmatmul.mubr.msk.f32.gmra.mrb[14].mxu1 %vm652_vm0, %v564_v43 }
 0x1b0   : > { %v569_v27 = vpop.f32.mrb[32].mxu0 }
 0x1b1   : > { %v571_v28 = vpop.f32.mrb[33].mxu0  ;;  %3024 = vmatprep.mubr.msk.f32.mxu1 %vm652_vm0, %v569_v27 }
 0x1b4   : > { %v574_v45 = vpop.f32.mrb[34].mxu0 }
 0x1b5   : > { %v576_v22 = vpop.f32.mrb[35].mxu0  ;;  %3025 = vmatmul.mubr.msk.f32.gmra.mrb[16].mxu1 %vm652_vm0, %v574_v45 }
 0x1b6   : > { %v273_v22 = vld [vmem:[#allocation5 + $0x10] sm:$0xff] }
 0x1b8   : > { %v579_v48 = vpop.f32.mrb[36].mxu0 }
 0x1b9   : > { %v581_v21 = vpop.f32.mrb[37].mxu0  ;;  %3027 = vmatprep.mubr.msk.f32.mxu1 %vm652_vm0, %v579_v48 }
 0x1ba   : > { %v3258_v21 = vpack.c.bf16 %v274_v18, %v273_v22 }
 0x1bc   : > { %v584_v25 = vpop.f32.mrb[38].mxu0  ;;  %3259 = vmatprep.subr.bf16.mxu1 %v3258_v21 }
 0x1bd   : > { %v586_v19 = vpop.f32.mrb[39].mxu0  ;;  %3028 = vmatmul.mubr.msk.f32.gmra.mrb[18].mxu1 %vm652_vm0, %v584_v25 }
 0x1be   : > { %3261 = vmatpush3.bf16.msra.mxu1 %v3258_v21 }
 0x1bf   : > { %3262 = vmatprep.subr.bf16.mxu1 %v3558_v0 }
 0x1c0   : > { %v589_v24 = vpop.f32.mrb[40].mxu0 }
 0x1c1   : > { %v591_v30 = vpop.f32.mrb[41].mxu0  ;;  %3030 = vmatprep.mubr.msk.f32.mxu1 %vm652_vm0, %v589_v24 }
 0x1c4   : > { %v594_v43 = vpop.f32.mrb[42].mxu0 }
 0x1c5   : > { %v596_v28 = vpop.f32.mrb[43].mxu0  ;;  %3031 = vmatmul.mubr.msk.f32.gmra.mrb[20].mxu1 %vm652_vm0, %v594_v43 }
 0x1c8   : > { %v599_v27 = vpop.f32.mrb[44].mxu0 }
 0x1c9   : > { %v601_v45 = vpop.f32.mrb[45].mxu0  ;;  %3033 = vmatprep.mubr.msk.f32.mxu1 %vm652_vm0, %v599_v27 }
 0x1cc   : > { %v604_v48 = vpop.f32.mrb[46].mxu0 }
 0x1cd   : > { %v606_v19 = vpop.f32.mrb[47].mxu0  ;;  %3034 = vmatmul.mubr.msk.f32.gmra.mrb[22].mxu1 %vm652_vm0, %v604_v48 }
 0x1d0   : > { %v609_v25 = vpop.f32.mrb[48].mxu0 }
 0x1d1   : > { %v611_v24 = vpop.f32.mrb[49].mxu0  ;;  %3036 = vmatprep.mubr.msk.f32.mxu1 %vm652_vm0, %v609_v25 }
 0x1d4   : > { %v614_v30 = vpop.f32.mrb[50].mxu0 }
 0x1d5   : > { %v616_v43 = vpop.f32.mrb[51].mxu0  ;;  %3037 = vmatmul.mubr.msk.f32.gmra.mrb[24].mxu1 %vm652_vm0, %v614_v30 }
 0x1d8   : > { %v619_v28 = vpop.f32.mrb[52].mxu0 }
 0x1d9   : > { %v621_v45 = vpop.f32.mrb[53].mxu0  ;;  %3039 = vmatprep.mubr.msk.f32.mxu1 %vm652_vm0, %v619_v28  ;;  %v4121_v28 = vld [vmem:[#allocation5 + $0x8] ss:$0 sm:$0xff] }
 0x1dc   : > { %v624_v18 = vpop.f32.mrb[54].mxu0 }
 0x1dd   : > { %v626_v27 = vpop.f32.mrb[55].mxu0  ;;  %3040 = vmatmul.mubr.msk.f32.gmra.mrb[26].mxu1 %vm652_vm0, %v624_v18 }
 0x1e0   : > { %v629_v22 = vpop.f32.mrb[56].mxu0 }
 0x1e1   : > { %v631_v21 = vpop.f32.mrb[57].mxu0  ;;  %3042 = vmatprep.mubr.msk.f32.mxu1 %vm652_vm0, %v629_v22 }
 0x1e4   : > { %v634_v48 = vpop.f32.mrb[58].mxu0 }
 0x1e5   : > { %v636_v19 = vpop.f32.mrb[59].mxu0  ;;  %3043 = vmatmul.mubr.msk.f32.gmra.mrb[28].mxu1 %vm652_vm0, %v634_v48 }
 0x1e8   : > { %v639_v25 = vpop.f32.mrb[60].mxu0 }
 0x1e9   : > { %v641_v24 = vpop.f32.mrb[61].mxu0  ;;  %3045 = vmatprep.mubr.msk.f32.mxu1 %vm652_vm0, %v639_v25 }
 0x1ec   : > { %v644_v30 = vpop.f32.mrb[62].mxu0 }
 0x1ed   : > { %v646_v43 = vpop.f32.mrb[63].mxu0  ;;  %3046 = vmatmul.mubr.msk.f32.gmra.mrb[30].mxu1 %vm652_vm0, %v644_v30 }
 0x248   : > { %v3002_v45 = vpop.f32.mrb[0].mxu1 }
 0x249   : > { %v821_v18 = vadd.f32 %v3002_v45, %v4121_v28  ;;  %v815_v27 = vpop.f32.mrb[1].mxu1 }
 0x24a   : > { %v816_v22 = vadd.f32 %v4121_v28, %v815_v27 }
 0x24b   : > { %v975_v19 = vmax.f32 %v821_v18, 0.0 }
 0x24c   : > { %v974_v21 = vmax.f32 %v816_v22, 0.0 }
 0x24e   : > { %3052 = vmatprep.mubr.msk.f32.mxu1 %vm1010_vm1, %v974_v21 }
 0x24f   : > { %3053 = vmatmul.mubr.msk.f32.vlgmr.msra.gmra.mrb[32].mxu1 %vm1010_vm1, %v975_v19 }
 0x250   : > { %v3005_v48 = vpop.f32.mrb[2].mxu1 }
 0x251   : > { %v831_v25 = vadd.f32 %v3005_v48, %v4121_v28  ;;  %v825_v24 = vpop.f32.mrb[3].mxu1 }
 0x252   : > { %v826_v30 = vadd.f32 %v4121_v28, %v825_v24 }
 0x253   : > { %v977_v16 = vmax.f32 %v831_v25, 0.0 }
 0x254   : > { %v976_v43 = vmax.f32 %v826_v30, 0.0 }
 0x256   : > { %3055 = vmatprep.mubr.msk.f32.mxu1 %vm1010_vm1, %v976_v43 }
 0x257   : > { %3056 = vmatmul.mubr.msk.f32.gmra.mrb[34].mxu1 %vm1010_vm1, %v977_v16 }
 0x258   : > { %v3008_v45 = vpop.f32.mrb[4].mxu1 }
 0x259   : > { %v841_v27 = vadd.f32 %v3008_v45, %v4121_v28  ;;  %v835_v18 = vpop.f32.mrb[5].mxu1 }
 0x25a   : > { %v836_v22 = vadd.f32 %v4121_v28, %v835_v18 }
 0x25b   : > { %v979_v19 = vmax.f32 %v841_v27, 0.0 }
 0x25c   : > { %v978_v21 = vmax.f32 %v836_v22, 0.0 }
 0x25e   : > { %3058 = vmatprep.mubr.msk.f32.mxu1 %vm1010_vm1, %v978_v21 }
 0x25f   : > { %3059 = vmatmul.mubr.msk.f32.gmra.mrb[36].mxu1 %vm1010_vm1, %v979_v19 }
 0x260   : > { %v3011_v48 = vpop.f32.mrb[6].mxu1 }
 0x261   : > { %v851_v24 = vadd.f32 %v3011_v48, %v4121_v28  ;;  %v845_v25 = vpop.f32.mrb[7].mxu1 }
 0x262   : > { %v846_v30 = vadd.f32 %v4121_v28, %v845_v25 }
 0x263   : > { %v981_v16 = vmax.f32 %v851_v24, 0.0 }
 0x264   : > { %v980_v43 = vmax.f32 %v846_v30, 0.0 }
 0x266   : > { %3061 = vmatprep.mubr.msk.f32.mxu1 %vm1010_vm1, %v980_v43 }
 0x267   : > { %3062 = vmatmul.mubr.msk.f32.gmra.mrb[38].mxu1 %vm1010_vm1, %v981_v16 }
 0x268   : > { %v3014_v45 = vpop.f32.mrb[8].mxu1 }
 0x269   : > { %v861_v18 = vadd.f32 %v3014_v45, %v4121_v28  ;;  %v855_v27 = vpop.f32.mrb[9].mxu1 }
 0x26a   : > { %v856_v22 = vadd.f32 %v4121_v28, %v855_v27 }
 0x26b   : > { %v983_v19 = vmax.f32 %v861_v18, 0.0 }
 0x26c   : > { %v982_v21 = vmax.f32 %v856_v22, 0.0 }
 0x26e   : > { %3064 = vmatprep.mubr.msk.f32.mxu1 %vm1010_vm1, %v982_v21 }
 0x26f   : > { %3065 = vmatmul.mubr.msk.f32.gmra.mrb[40].mxu1 %vm1010_vm1, %v983_v19 }
 0x270   : > { %v3017_v48 = vpop.f32.mrb[10].mxu1 }
 0x271   : > { %v871_v25 = vadd.f32 %v3017_v48, %v4121_v28  ;;  %v865_v24 = vpop.f32.mrb[11].mxu1 }
 0x272   : > { %v866_v30 = vadd.f32 %v4121_v28, %v865_v24 }
 0x273   : > { %v985_v16 = vmax.f32 %v871_v25, 0.0 }
 0x274   : > { %v984_v43 = vmax.f32 %v866_v30, 0.0 }
 0x276   : > { %3067 = vmatprep.mubr.msk.f32.mxu1 %vm1010_vm1, %v984_v43 }
 0x277   : > { %3068 = vmatmul.mubr.msk.f32.gmra.mrb[42].mxu1 %vm1010_vm1, %v985_v16 }
 0x278   : > { %v3020_v45 = vpop.f32.mrb[12].mxu1 }
 0x279   : > { %v881_v27 = vadd.f32 %v3020_v45, %v4121_v28  ;;  %v875_v18 = vpop.f32.mrb[13].mxu1 }
 0x27a   : > { %v876_v22 = vadd.f32 %v4121_v28, %v875_v18 }
 0x27b   : > { %v987_v19 = vmax.f32 %v881_v27, 0.0 }
 0x27c   : > { %v986_v21 = vmax.f32 %v876_v22, 0.0 }
 0x27e   : > { %3070 = vmatprep.mubr.msk.f32.mxu1 %vm1010_vm1, %v986_v21 }
 0x27f   : > { %3071 = vmatmul.mubr.msk.f32.gmra.mrb[44].mxu1 %vm1010_vm1, %v987_v19 }
 0x280   : > { %v3023_v48 = vpop.f32.mrb[14].mxu1 }
 0x281   : > { %v891_v24 = vadd.f32 %v3023_v48, %v4121_v28  ;;  %v885_v25 = vpop.f32.mrb[15].mxu1 }
 0x282   : > { %v886_v30 = vadd.f32 %v4121_v28, %v885_v25 }
 0x283   : > { %v989_v16 = vmax.f32 %v891_v24, 0.0 }
 0x284   : > { %v988_v43 = vmax.f32 %v886_v30, 0.0 }
 0x286   : > { %3073 = vmatprep.mubr.msk.f32.mxu1 %vm1010_vm1, %v988_v43 }
 0x287   : > { %3074 = vmatmul.mubr.msk.f32.gmra.mrb[46].mxu1 %vm1010_vm1, %v989_v16 }
 0x288   : > { %v3026_v45 = vpop.f32.mrb[16].mxu1 }
 0x289   : > { %v901_v18 = vadd.f32 %v3026_v45, %v4121_v28  ;;  %v895_v27 = vpop.f32.mrb[17].mxu1 }
 0x28a   : > { %v896_v22 = vadd.f32 %v4121_v28, %v895_v27 }
 0x28b   : > { %v991_v19 = vmax.f32 %v901_v18, 0.0 }
 0x28c   : > { %v990_v21 = vmax.f32 %v896_v22, 0.0 }
 0x28e   : > { %3076 = vmatprep.mubr.msk.f32.mxu1 %vm1010_vm1, %v990_v21 }
 0x28f   : > { %3077 = vmatmul.mubr.msk.f32.gmra.mrb[48].mxu1 %vm1010_vm1, %v991_v19 }
 0x290   : > { %v3029_v48 = vpop.f32.mrb[18].mxu1 }
 0x291   : > { %v911_v25 = vadd.f32 %v3029_v48, %v4121_v28  ;;  %v905_v24 = vpop.f32.mrb[19].mxu1 }
 0x292   : > { %v906_v30 = vadd.f32 %v4121_v28, %v905_v24 }
 0x293   : > { %v993_v16 = vmax.f32 %v911_v25, 0.0 }
 0x294   : > { %v992_v43 = vmax.f32 %v906_v30, 0.0 }
 0x296   : > { %3079 = vmatprep.mubr.msk.f32.mxu1 %vm1010_vm1, %v992_v43 }
 0x297   : > { %3080 = vmatmul.mubr.msk.f32.gmra.mrb[50].mxu1 %vm1010_vm1, %v993_v16 }
 0x298   : > { %v3032_v45 = vpop.f32.mrb[20].mxu1 }
 0x299   : > { %v921_v27 = vadd.f32 %v3032_v45, %v4121_v28  ;;  %v915_v18 = vpop.f32.mrb[21].mxu1 }
 0x29a   : > { %v916_v22 = vadd.f32 %v4121_v28, %v915_v18 }
 0x29b   : > { %v995_v19 = vmax.f32 %v921_v27, 0.0 }
 0x29c   : > { %v994_v21 = vmax.f32 %v916_v22, 0.0 }
 0x29e   : > { %3082 = vmatprep.mubr.msk.f32.mxu1 %vm1010_vm1, %v994_v21 }
 0x29f   : > { %3083 = vmatmul.mubr.msk.f32.gmra.mrb[52].mxu1 %vm1010_vm1, %v995_v19 }
 0x2a0   : > { %v3035_v48 = vpop.f32.mrb[22].mxu1 }
 0x2a1   : > { %v931_v24 = vadd.f32 %v3035_v48, %v4121_v28  ;;  %v925_v25 = vpop.f32.mrb[23].mxu1 }
 0x2a2   : > { %v926_v30 = vadd.f32 %v4121_v28, %v925_v25 }
 0x2a3   : > { %v997_v16 = vmax.f32 %v931_v24, 0.0 }
 0x2a4   : > { %v996_v43 = vmax.f32 %v926_v30, 0.0 }
 0x2a6   : > { %3085 = vmatprep.mubr.msk.f32.mxu1 %vm1010_vm1, %v996_v43 }
 0x2a7   : > { %3086 = vmatmul.mubr.msk.f32.gmra.mrb[54].mxu1 %vm1010_vm1, %v997_v16 }
 0x2a8   : > { %v3038_v45 = vpop.f32.mrb[24].mxu1 }
 0x2a9   : > { %v941_v18 = vadd.f32 %v3038_v45, %v4121_v28  ;;  %v935_v27 = vpop.f32.mrb[25].mxu1 }
 0x2aa   : > { %v936_v22 = vadd.f32 %v4121_v28, %v935_v27 }
 0x2ab   : > { %v999_v19 = vmax.f32 %v941_v18, 0.0 }
 0x2ac   : > { %v998_v21 = vmax.f32 %v936_v22, 0.0 }
 0x2ae   : > { %3088 = vmatprep.mubr.msk.f32.mxu1 %vm1010_vm1, %v998_v21 }
 0x2af   : > { %3089 = vmatmul.mubr.msk.f32.gmra.mrb[56].mxu1 %vm1010_vm1, %v999_v19 }
 0x2b0   : > { %v3041_v48 = vpop.f32.mrb[26].mxu1 }
 0x2b1   : > { %v951_v25 = vadd.f32 %v3041_v48, %v4121_v28  ;;  %v945_v24 = vpop.f32.mrb[27].mxu1 }
 0x2b2   : > { %v946_v30 = vadd.f32 %v4121_v28, %v945_v24 }
 0x2b3   : > { %v1001_v16 = vmax.f32 %v951_v25, 0.0 }
 0x2b4   : > { %v1000_v43 = vmax.f32 %v946_v30, 0.0 }
 0x2b6   : > { %3091 = vmatprep.mubr.msk.f32.mxu1 %vm1010_vm1, %v1000_v43 }
 0x2b7   : > { %3092 = vmatmul.mubr.msk.f32.gmra.mrb[58].mxu1 %vm1010_vm1, %v1001_v16 }
 0x2b8   : > { %v3044_v45 = vpop.f32.mrb[28].mxu1 }
 0x2b9   : > { %v961_v27 = vadd.f32 %v3044_v45, %v4121_v28  ;;  %v955_v18 = vpop.f32.mrb[29].mxu1  ;;  %v4189_v45 = vld [vmem:[#allocation5 + $0x20] ss:$0 sm:$0xff] }
 0x2ba   : > { %v956_v22 = vadd.f32 %v4121_v28, %v955_v18 }
 0x2bb   : > { %v1003_v19 = vmax.f32 %v961_v27, 0.0 }
 0x2bc   : > { %v1002_v21 = vmax.f32 %v956_v22, 0.0 }
 0x2be   : > { %3094 = vmatprep.mubr.msk.f32.mxu1 %vm1010_vm1, %v1002_v21 }
 0x2bf   : > { %3095 = vmatmul.mubr.msk.f32.gmra.mrb[60].mxu1 %vm1010_vm1, %v1003_v19 }
 0x2c0   : > { %v3047_v48 = vpop.f32.mrb[30].mxu1 }
 0x2c1   : > { %v971_v24 = vadd.f32 %v3047_v48, %v4121_v28  ;;  %v965_v25 = vpop.f32.mrb[31].mxu1 }
 0x2c2   : > { %v966_v30 = vadd.f32 %v4121_v28, %v965_v25 }
 0x2c3   : > { %v1005_v16 = vmax.f32 %v971_v24, 0.0 }
 0x2c4   : > { %v1004_v43 = vmax.f32 %v966_v30, 0.0 }
 0x2c6   : > { %3097 = vmatprep.mubr.msk.f32.mxu1 %vm1010_vm1, %v1004_v43 }
 0x2c7   : > { %3098 = vmatmul.mubr.msk.f32.gmra.mrb[62].mxu1 %vm1010_vm1, %v1005_v16 }
 0x2c8   : > { %1428 = vmatprep.mubr.f32.mxu1 %v348_v14 }
 0x322   : > { %v3054_v27 = vpop.f32.mrb[32].mxu1 }
 0x323   : > { %v1179_v18 = vadd.f32 %v3054_v27, %v4189_v45  ;;  %v1173_v22 = vpop.f32.mrb[33].mxu1 }
 0x324   : > { %v1174_v21 = vadd.f32 %v4189_v45, %v1173_v22 }
 0x325   : > { %v1333_v19 = vmax.f32 %v1179_v18, 0.0 }
 0x326   : > { %v1332_v48 = vmax.f32 %v1174_v21, 0.0 }
 0x328   : > { %v3263_v28 = vpack.c.bf16 %v1333_v19, %v1332_v48 }
 0x32a   : > { %v3057_v25 = vpop.f32.mrb[34].mxu1  ;;  %3264 = vmatpush1.bf16.msra.mxu1 %v3263_v28 }
 0x32b   : > { %v1189_v24 = vadd.f32 %v3057_v25, %v4189_v45  ;;  %v1183_v30 = vpop.f32.mrb[35].mxu1  ;;  %3265 = vmatprep.subr.bf16.mxu1 %v3558_v0 }
 0x32c   : > { %v1184_v14 = vadd.f32 %v4189_v45, %v1183_v30 }
 0x32d   : > { %v1335_v43 = vmax.f32 %v1189_v24, 0.0 }
 0x32e   : > { %v1334_v16 = vmax.f32 %v1184_v14, 0.0 }
 0x330   : > { %v3266_v15 = vpack.c.bf16 %v1335_v43, %v1334_v16 }
 0x332   : > { %v3060_v11 = vpop.f32.mrb[36].mxu1  ;;  %3267 = vmatpush1.bf16.msra.mxu1 %v3266_v15 }
 0x333   : > { %v1199_v27 = vadd.f32 %v3060_v11, %v4189_v45  ;;  %v1193_v22 = vpop.f32.mrb[37].mxu1  ;;  %3268 = vmatprep.subr.bf16.mxu1 %v3558_v0 }
 0x334   : > { %v1194_v18 = vadd.f32 %v4189_v45, %v1193_v22 }
 0x335   : > { %v1337_v21 = vmax.f32 %v1199_v27, 0.0 }
 0x336   : > { %v1336_v19 = vmax.f32 %v1194_v18, 0.0 }
 0x338   : > { %v3269_v48 = vpack.c.bf16 %v1337_v21, %v1336_v19 }
 0x33a   : > { %v3063_v28 = vpop.f32.mrb[38].mxu1  ;;  %3270 = vmatpush1.bf16.msra.mxu1 %v3269_v48 }
 0x33b   : > { %v1209_v25 = vadd.f32 %v3063_v28, %v4189_v45  ;;  %v1203_v30 = vpop.f32.mrb[39].mxu1  ;;  %3271 = vmatprep.subr.bf16.mxu1 %v3558_v0 }
 0x33c   : > { %v1204_v24 = vadd.f32 %v4189_v45, %v1203_v30 }
 0x33d   : > { %v1339_v15 = vmax.f32 %v1209_v25, 0.0 }
 0x33e   : > { %v1338_v14 = vmax.f32 %v1204_v24, 0.0 }
 0x340   : > { %v3272_v11 = vpack.c.bf16 %v1339_v15, %v1338_v14 }
 0x342   : > { %v3066_v43 = vpop.f32.mrb[40].mxu1  ;;  %3273 = vmatpush1.bf16.msra.mxu1 %v3272_v11 }
 0x343   : > { %v1219_v16 = vadd.f32 %v3066_v43, %v4189_v45  ;;  %v1213_v22 = vpop.f32.mrb[41].mxu1  ;;  %3274 = vmatprep.subr.bf16.mxu1 %v3558_v0 }
 0x344   : > { %v1214_v27 = vadd.f32 %v4189_v45, %v1213_v22 }
 0x345   : > { %v1341_v18 = vmax.f32 %v1219_v16, 0.0 }
 0x346   : > { %v1340_v21 = vmax.f32 %v1214_v27, 0.0 }
 0x348   : > { %v3275_v19 = vpack.c.bf16 %v1341_v18, %v1340_v21 }
 0x34a   : > { %v3069_v48 = vpop.f32.mrb[42].mxu1  ;;  %3276 = vmatpush1.bf16.msra.mxu1 %v3275_v19 }
 0x34b   : > { %v1229_v28 = vadd.f32 %v3069_v48, %v4189_v45  ;;  %v1223_v30 = vpop.f32.mrb[43].mxu1  ;;  %3277 = vmatprep.subr.bf16.mxu1 %v3558_v0 }
 0x34c   : > { %v1224_v25 = vadd.f32 %v4189_v45, %v1223_v30 }
 0x34d   : > { %v1343_v24 = vmax.f32 %v1229_v28, 0.0 }
 0x34e   : > { %v1342_v15 = vmax.f32 %v1224_v25, 0.0 }
 0x350   : > { %v3278_v14 = vpack.c.bf16 %v1343_v24, %v1342_v15 }
 0x352   : > { %v3072_v11 = vpop.f32.mrb[44].mxu1  ;;  %3279 = vmatpush1.bf16.msra.mxu1 %v3278_v14 }
 0x353   : > { %v1239_v43 = vadd.f32 %v3072_v11, %v4189_v45  ;;  %v1233_v22 = vpop.f32.mrb[45].mxu1  ;;  %3280 = vmatprep.subr.bf16.mxu1 %v3558_v0 }
 0x354   : > { %v1234_v16 = vadd.f32 %v4189_v45, %v1233_v22 }
 0x355   : > { %v1345_v27 = vmax.f32 %v1239_v43, 0.0 }
 0x356   : > { %v1344_v18 = vmax.f32 %v1234_v16, 0.0 }
 0x358   : > { %v3281_v21 = vpack.c.bf16 %v1345_v27, %v1344_v18 }
 0x35a   : > { %v3075_v19 = vpop.f32.mrb[46].mxu1  ;;  %3282 = vmatpush1.bf16.msra.mxu1 %v3281_v21 }
 0x35b   : > { %v1249_v48 = vadd.f32 %v3075_v19, %v4189_v45  ;;  %v1243_v30 = vpop.f32.mrb[47].mxu1  ;;  %3283 = vmatprep.subr.bf16.mxu1 %v3558_v0 }
 0x35c   : > { %v1244_v28 = vadd.f32 %v4189_v45, %v1243_v30 }
 0x35d   : > { %v1347_v25 = vmax.f32 %v1249_v48, 0.0 }
 0x35e   : > { %v1346_v24 = vmax.f32 %v1244_v28, 0.0 }
 0x360   : > { %v3284_v15 = vpack.c.bf16 %v1347_v25, %v1346_v24 }
 0x362   : > { %v3078_v14 = vpop.f32.mrb[48].mxu1  ;;  %3285 = vmatpush1.bf16.msra.mxu1 %v3284_v15 }
 0x363   : > { %v1259_v11 = vadd.f32 %v3078_v14, %v4189_v45  ;;  %v1253_v22 = vpop.f32.mrb[49].mxu1  ;;  %3286 = vmatprep.subr.bf16.mxu1 %v3558_v0 }
 0x364   : > { %v1254_v43 = vadd.f32 %v4189_v45, %v1253_v22 }
 0x365   : > { %v1349_v16 = vmax.f32 %v1259_v11, 0.0 }
 0x366   : > { %v1348_v27 = vmax.f32 %v1254_v43, 0.0 }
 0x368   : > { %v3287_v18 = vpack.c.bf16 %v1349_v16, %v1348_v27 }
 0x36a   : > { %v3081_v21 = vpop.f32.mrb[50].mxu1  ;;  %3288 = vmatpush1.bf16.msra.mxu1 %v3287_v18 }
 0x36b   : > { %v1269_v19 = vadd.f32 %v3081_v21, %v4189_v45  ;;  %v1263_v30 = vpop.f32.mrb[51].mxu1  ;;  %3289 = vmatprep.subr.bf16.mxu1 %v3558_v0 }
 0x36c   : > { %v1264_v48 = vadd.f32 %v4189_v45, %v1263_v30 }
 0x36d   : > { %v1351_v28 = vmax.f32 %v1269_v19, 0.0 }
 0x36e   : > { %v1350_v25 = vmax.f32 %v1264_v48, 0.0 }
 0x370   : > { %v3290_v24 = vpack.c.bf16 %v1351_v28, %v1350_v25 }
 0x372   : > { %v3084_v15 = vpop.f32.mrb[52].mxu1  ;;  %3291 = vmatpush1.bf16.msra.mxu1 %v3290_v24 }
 0x373   : > { %v1279_v14 = vadd.f32 %v3084_v15, %v4189_v45  ;;  %v1273_v22 = vpop.f32.mrb[53].mxu1  ;;  %3292 = vmatprep.subr.bf16.mxu1 %v3558_v0 }
 0x374   : > { %v1274_v11 = vadd.f32 %v4189_v45, %v1273_v22 }
 0x375   : > { %v1353_v43 = vmax.f32 %v1279_v14, 0.0 }
 0x376   : > { %v1352_v16 = vmax.f32 %v1274_v11, 0.0 }
 0x378   : > { %v3293_v27 = vpack.c.bf16 %v1353_v43, %v1352_v16 }
 0x37a   : > { %v3087_v18 = vpop.f32.mrb[54].mxu1  ;;  %3294 = vmatpush1.bf16.msra.mxu1 %v3293_v27 }
 0x37b   : > { %v1289_v21 = vadd.f32 %v3087_v18, %v4189_v45  ;;  %v1283_v30 = vpop.f32.mrb[55].mxu1  ;;  %3295 = vmatprep.subr.bf16.mxu1 %v3558_v0 }
 0x37c   : > { %v1284_v19 = vadd.f32 %v4189_v45, %v1283_v30 }
 0x37d   : > { %v1355_v48 = vmax.f32 %v1289_v21, 0.0 }
 0x37e   : > { %v1354_v28 = vmax.f32 %v1284_v19, 0.0 }
 0x380   : > { %v3296_v25 = vpack.c.bf16 %v1355_v48, %v1354_v28 }
 0x382   : > { %v3090_v24 = vpop.f32.mrb[56].mxu1  ;;  %3297 = vmatpush1.bf16.msra.mxu1 %v3296_v25 }
 0x383   : > { %v1299_v15 = vadd.f32 %v3090_v24, %v4189_v45  ;;  %v1293_v22 = vpop.f32.mrb[57].mxu1  ;;  %3298 = vmatprep.subr.bf16.mxu1 %v3558_v0 }
 0x384   : > { %v1294_v14 = vadd.f32 %v4189_v45, %v1293_v22 }
 0x385   : > { %v1357_v11 = vmax.f32 %v1299_v15, 0.0 }
 0x386   : > { %v1356_v43 = vmax.f32 %v1294_v14, 0.0 }
 0x388   : > { %v3299_v16 = vpack.c.bf16 %v1357_v11, %v1356_v43 }
 0x38a   : > { %v3093_v27 = vpop.f32.mrb[58].mxu1  ;;  %3300 = vmatpush1.bf16.msra.mxu1 %v3299_v16 }
 0x38b   : > { %v1309_v18 = vadd.f32 %v3093_v27, %v4189_v45  ;;  %v1303_v30 = vpop.f32.mrb[59].mxu1  ;;  %3301 = vmatprep.subr.bf16.mxu1 %v3558_v0 }
 0x38c   : > { %v1304_v21 = vadd.f32 %v4189_v45, %v1303_v30 }
 0x38d   : > { %v1359_v19 = vmax.f32 %v1309_v18, 0.0 }
 0x38e   : > { %v1358_v48 = vmax.f32 %v1304_v21, 0.0 }
 0x390   : > { %v3302_v28 = vpack.c.bf16 %v1359_v19, %v1358_v48 }
 0x392   : > { %v3096_v25 = vpop.f32.mrb[60].mxu1  ;;  %3303 = vmatpush1.bf16.msra.mxu1 %v3302_v28  ;;  %v4681_v28 = vunpack.c.l.bf16 %v4028_v49 }
 0x393   : > { %v1319_v24 = vadd.f32 %v3096_v25, %v4189_v45  ;;  %v1313_v22 = vpop.f32.mrb[61].mxu1  ;;  %3304 = vmatprep.subr.bf16.mxu1 %v3558_v0  ;;  %v4683_v25 = vunpack.c.l.bf16 %v4037_v34 }
 0x394   : > { %v1314_v15 = vadd.f32 %v4189_v45, %v1313_v22  ;;  %v4687_v22 = vunpack.c.l.bf16 %v4055_v31 }
 0x395   : > { %v1361_v14 = vmax.f32 %v1319_v24, 0.0  ;;  %v4685_v24 = vunpack.c.l.bf16 %v4046_v33 }
 0x396   : > { %v1360_v11 = vmax.f32 %v1314_v15, 0.0  ;;  %v4689_v15 = vunpack.c.l.bf16 %v4064_v46 }
 0x398   : > { %v3305_v43 = vpack.c.bf16 %v1361_v14, %v1360_v11  ;;  %v4691_v14 = vunpack.c.l.bf16 %v4073_v39 }
 0x39a   : > { %v3099_v16 = vpop.f32.mrb[62].mxu1  ;;  %3306 = vmatpush1.bf16.msra.mxu1 %v3305_v43 }
 0x39b   : > { %v1329_v27 = vadd.f32 %v3099_v16, %v4189_v45  ;;  %v1323_v30 = vpop.f32.mrb[63].mxu1  ;;  %3307 = vmatprep.subr.bf16.mxu1 %v3558_v0  ;;  %v4644_v0 = vunpack.c.h.bf16 %v3866_v9  ;;  %v4667_v9 = vunpack.c.l.bf16 %v3965_v44 }
 0x39c   : > { %v1324_v18 = vadd.f32 %v4189_v45, %v1323_v30  ;;  %v4679_v45 = vunpack.c.l.bf16 %v4019_v36 }
 0x39d   : > { %v1363_v21 = vmax.f32 %v1329_v27, 0.0 }
 0x39e   : > { %v1362_v19 = vmax.f32 %v1324_v18, 0.0 }
 0x3a0   : > { %v3308_v48 = vpack.c.bf16 %v1363_v21, %v1362_v19 }
 0x3a2   : > { %3309 = vmatpush1.bf16.msra.mxu1 %v3308_v48 }
 0x3a5   : > { %1429 = vmatmul.mubr.f32.vlgmr.msra.gmra.mrb[64].mxu1 %v347_v52  ;;  %v4647_v52 = vunpack.c.l.bf16 %v3875_v13  ;;  %v4669_v13 = vunpack.c.l.bf16 %v3974_v47 }
 0x3a6   : > { %1433 = vmatprep.mubr.f32.mxu1 %v350_v53  ;;  %v4648_v53 = vunpack.c.h.bf16 %v3884_v17  ;;  %v4670_v17 = vunpack.c.h.bf16 %v3983_v50 }
 0x3a9   : > { %1434 = vmatmul.mubr.f32.gmra.mrb[66].mxu1 %v349_v55  ;;  %v4650_v55 = vunpack.c.h.bf16 %v3893_v20 }
 0x3aa   : > { %1438 = vmatprep.mubr.f32.mxu1 %v352_v56  ;;  %v4651_v56 = vunpack.c.l.bf16 %v3893_v20  ;;  %v276_v20 = vld [vmem:[#allocation5 + $0x28] sm:$0xff] }
 0x3ad   : > { %1439 = vmatmul.mubr.f32.gmra.mrb[68].mxu1 %v351_v58  ;;  %v4653_v58 = vunpack.c.l.bf16 %v3902_v23  ;;  %v277_v23 = vld [vmem:[#allocation5 + $0x30] sm:$0xff] }
 0x3ae   : > { %1443 = vmatprep.mubr.f32.mxu1 %v354_v59  ;;  %v4654_v59 = vunpack.c.h.bf16 %v3911_v26  ;;  %v3310_v26 = vpack.c.bf16 %v277_v23, %v276_v20 }
 0x3b0   : > { %3311 = vmatprep.subr.bf16.mxu0 %v3310_v26 }
 0x3b1   : > { %1444 = vmatmul.mubr.f32.gmra.mrb[70].mxu1 %v353_v61  ;;  %v4656_v61 = vunpack.c.h.bf16 %v3920_v29  ;;  %3313 = vmatpush3.bf16.msra.mxu0 %v3310_v26 }
 0x3b2   : > { %1448 = vmatprep.mubr.f32.mxu1 %v356_v62  ;;  %v4657_v62 = vunpack.c.l.bf16 %v3920_v29  ;;  %v4671_v29 = vunpack.c.l.bf16 %v3983_v50  ;;  %v4678_v50 = vunpack.c.h.bf16 %v4019_v36  ;;  %v4686_v36 = vunpack.c.h.bf16 %v4055_v31 }
 0x3b5   : > { %1449 = vmatmul.mubr.f32.gmra.mrb[72].mxu1 %v355_v1  ;;  %v4659_v1 = vunpack.c.l.bf16 %v3929_v32  ;;  %v4672_v32 = vunpack.c.h.bf16 %v3992_v42 }
 0x3b6   : > { %1453 = vmatprep.mubr.f32.mxu1 %v358_v2  ;;  %v4660_v2 = vunpack.c.h.bf16 %v3938_v35  ;;  %v4673_v35 = vunpack.c.l.bf16 %v3992_v42  ;;  %v4680_v42 = vunpack.c.h.bf16 %v4028_v49  ;;  %v4688_v49 = vunpack.c.h.bf16 %v4064_v46 }
 0x3b9   : > { %1454 = vmatmul.mubr.f32.gmra.mrb[74].mxu1 %v357_v4  ;;  %v4662_v4 = vunpack.c.h.bf16 %v3947_v38 }
 0x3ba   : > { %1458 = vmatprep.mubr.f32.mxu1 %v360_v5  ;;  %v4663_v5 = vunpack.c.l.bf16 %v3947_v38  ;;  %v4674_v38 = vunpack.c.h.bf16 %v4001_v40 }
 0x3bd   : > { %1459 = vmatmul.mubr.f32.gmra.mrb[76].mxu1 %v359_v7  ;;  %v4665_v7 = vunpack.c.l.bf16 %v3956_v41  ;;  %v4675_v41 = vunpack.c.l.bf16 %v4001_v40  ;;  %v4682_v40 = vunpack.c.h.bf16 %v4037_v34  ;;  %v4690_v34 = vunpack.c.h.bf16 %v4073_v39 }
 0x3be   : > { %1463 = vmatprep.mubr.f32.mxu1 %v362_v8  ;;  %v4666_v8 = vunpack.c.h.bf16 %v3965_v44  ;;  %v4676_v44 = vunpack.c.h.bf16 %v4010_v37 }
 0x3c1   : > { %1464 = vmatmul.mubr.f32.gmra.mrb[78].mxu1 %v361_v10  ;;  %v4668_v10 = vunpack.c.h.bf16 %v3974_v47  ;;  %v4677_v47 = vunpack.c.l.bf16 %v4010_v37  ;;  %v4684_v37 = vunpack.c.h.bf16 %v4046_v33 }
 0x3c2   : > { %1468 = vmatprep.mubr.f32.mxu1 %v4644_v0 }
 0x3c5   : > { %1469 = vmatmul.mubr.f32.gmra.mrb[80].mxu1 %v4645_v12 }
 0x3c6   : > { %1473 = vmatprep.mubr.f32.mxu1 %v4646_v51 }
 0x3c9   : > { %1474 = vmatmul.mubr.f32.gmra.mrb[82].mxu1 %v4647_v52 }
 0x3ca   : > { %1478 = vmatprep.mubr.f32.mxu1 %v4648_v53 }
 0x3cd   : > { %1479 = vmatmul.mubr.f32.gmra.mrb[84].mxu1 %v4649_v54 }
 0x3ce   : > { %1483 = vmatprep.mubr.f32.mxu1 %v4650_v55 }
 0x3d1   : > { %1484 = vmatmul.mubr.f32.gmra.mrb[86].mxu1 %v4651_v56 }
 0x3d2   : > { %1488 = vmatprep.mubr.f32.mxu1 %v4652_v57 }
 0x3d5   : > { %1489 = vmatmul.mubr.f32.gmra.mrb[88].mxu1 %v4653_v58 }
 0x3d6   : > { %1493 = vmatprep.mubr.f32.mxu1 %v4654_v59 }
 0x3d9   : > { %1494 = vmatmul.mubr.f32.gmra.mrb[90].mxu1 %v4655_v60 }
 0x3da   : > { %1498 = vmatprep.mubr.f32.mxu1 %v4656_v61 }
 0x3dd   : > { %1499 = vmatmul.mubr.f32.gmra.mrb[92].mxu1 %v4657_v62 }
 0x3de   : > { %1503 = vmatprep.mubr.f32.mxu1 %v4658_v63 }
 0x3e1   : > { %1504 = vmatmul.mubr.f32.gmra.mrb[94].mxu1 %v4659_v1 }
 0x3e2   : > { %1508 = vmatprep.mubr.f32.mxu1 %v4660_v2 }
 0x3e5   : > { %1509 = vmatmul.mubr.f32.gmra.mrb[96].mxu1 %v4661_v3 }
 0x3e6   : > { %1513 = vmatprep.mubr.f32.mxu1 %v4662_v4 }
 0x3e9   : > { %1514 = vmatmul.mubr.f32.gmra.mrb[98].mxu1 %v4663_v5 }
 0x3ea   : > { %1518 = vmatprep.mubr.f32.mxu1 %v4664_v6 }
 0x3ed   : > { %1519 = vmatmul.mubr.f32.gmra.mrb[100].mxu1 %v4665_v7 }
 0x3ee   : > { %1523 = vmatprep.mubr.f32.mxu1 %v4666_v8 }
 0x3f1   : > { %1524 = vmatmul.mubr.f32.gmra.mrb[102].mxu1 %v4667_v9 }
 0x3f2   : > { %1528 = vmatprep.mubr.f32.mxu1 %v4668_v10 }
 0x3f5   : > { %1529 = vmatmul.mubr.f32.gmra.mrb[104].mxu1 %v4669_v13 }
 0x3f6   : > { %1533 = vmatprep.mubr.f32.mxu1 %v4670_v17 }
 0x3f9   : > { %1534 = vmatmul.mubr.f32.gmra.mrb[106].mxu1 %v4671_v29 }
 0x3fa   : > { %1538 = vmatprep.mubr.f32.mxu1 %v4672_v32 }
 0x3fd   : > { %1539 = vmatmul.mubr.f32.gmra.mrb[108].mxu1 %v4673_v35 }
 0x3fe   : > { %1543 = vmatprep.mubr.f32.mxu1 %v4674_v38 }
 0x401   : > { %1544 = vmatmul.mubr.f32.gmra.mrb[110].mxu1 %v4675_v41  ;;  %v279_v41 = vld [vmem:[#allocation5 + $0x40] sm:$0xff] }
 0x402   : > { %1548 = vmatprep.mubr.f32.mxu1 %v4676_v44  ;;  %3152 = vmatprep.subr.mxu0 %v279_v41 }
 0x405   : > { %1549 = vmatmul.mubr.f32.gmra.mrb[112].mxu1 %v4677_v47 }
 0x406   : > { %1553 = vmatprep.mubr.f32.mxu1 %v4678_v50 }
 0x409   : > { %1554 = vmatmul.mubr.f32.gmra.mrb[114].mxu1 %v4679_v45 }
 0x40a   : > { %1558 = vmatprep.mubr.f32.mxu1 %v4680_v42 }
 0x40d   : > { %1559 = vmatmul.mubr.f32.gmra.mrb[116].mxu1 %v4681_v28 }
 0x40e   : > { %1563 = vmatprep.mubr.f32.mxu1 %v4682_v40 }
 0x411   : > { %1564 = vmatmul.mubr.f32.gmra.mrb[118].mxu1 %v4683_v25 }
 0x412   : > { %1568 = vmatprep.mubr.f32.mxu1 %v4684_v37 }
 0x415   : > { %1569 = vmatmul.mubr.f32.gmra.mrb[120].mxu1 %v4685_v24 }
 0x416   : > { %1573 = vmatprep.mubr.f32.mxu1 %v4686_v36 }
 0x419   : > { %1574 = vmatmul.mubr.f32.gmra.mrb[122].mxu1 %v4687_v22 }
 0x41a   : > { %1578 = vmatprep.mubr.f32.mxu1 %v4688_v49 }
 0x41d   : > { %1579 = vmatmul.mubr.f32.gmra.mrb[124].mxu1 %v4689_v15 }
 0x41e   : > { %1583 = vmatprep.mubr.f32.mxu1 %v4690_v34 }
 0x421   : > { %1584 = vmatmul.mubr.f32.gmra.mrb[126].mxu1 %v4691_v14 }
 0x478   : > { %v1430_v33 = vpop.f32.mrb[64].mxu1 }
 0x479   : > { %v1432_v11 = vpop.f32.mrb[65].mxu1  ;;  %3104 = vmatprep.mubr.msk.f32.mxu0 %vm1010_vm1, %v1430_v33 }
 0x47a   : > { %v4396_v11 = vld [vmem:[#allocation5 + $0x38] ss:$0 sm:$0xff] }
 0x47c   : > { %v1435_v43 = vpop.f32.mrb[66].mxu1 }
 0x47d   : > { %v1437_v16 = vpop.f32.mrb[67].mxu1  ;;  %3105 = vmatmul.mubr.msk.f32.vlgmr.msra.gmra.mrb[64].mxu0 %vm1010_vm1, %v1435_v43 }
 0x47e   : > { %3153 = vmatpush3.msra.mxu0 %v279_v41 }
 0x480   : > { %v1440_v31 = vpop.f32.mrb[68].mxu1 }
 0x481   : > { %v1442_v27 = vpop.f32.mrb[69].mxu1  ;;  %3107 = vmatprep.mubr.msk.f32.mxu0 %vm1010_vm1, %v1440_v31 }
 0x484   : > { %v1445_v46 = vpop.f32.mrb[70].mxu1 }
 0x485   : > { %v1447_v30 = vpop.f32.mrb[71].mxu1  ;;  %3108 = vmatmul.mubr.msk.f32.gmra.mrb[66].mxu0 %vm1010_vm1, %v1445_v46 }
 0x488   : > { %v1450_v18 = vpop.f32.mrb[72].mxu1 }
 0x489   : > { %v1452_v21 = vpop.f32.mrb[73].mxu1  ;;  %3110 = vmatprep.mubr.msk.f32.mxu0 %vm1010_vm1, %v1450_v18 }
 0x48c   : > { %v1455_v39 = vpop.f32.mrb[74].mxu1 }
 0x48d   : > { %v1457_v19 = vpop.f32.mrb[75].mxu1  ;;  %3111 = vmatmul.mubr.msk.f32.gmra.mrb[68].mxu0 %vm1010_vm1, %v1455_v39 }
 0x490   : > { %v1460_v48 = vpop.f32.mrb[76].mxu1 }
 0x491   : > { %v1462_v0 = vpop.f32.mrb[77].mxu1  ;;  %3113 = vmatprep.mubr.msk.f32.mxu0 %vm1010_vm1, %v1460_v48 }
 0x494   : > { %v1465_v12 = vpop.f32.mrb[78].mxu1 }
 0x495   : > { %v1467_v51 = vpop.f32.mrb[79].mxu1  ;;  %3114 = vmatmul.mubr.msk.f32.gmra.mrb[70].mxu0 %vm1010_vm1, %v1465_v12 }
 0x498   : > { %v1470_v52 = vpop.f32.mrb[80].mxu1 }
 0x499   : > { %v1472_v53 = vpop.f32.mrb[81].mxu1  ;;  %3116 = vmatprep.mubr.msk.f32.mxu0 %vm1010_vm1, %v1470_v52 }
 0x49c   : > { %v1475_v54 = vpop.f32.mrb[82].mxu1 }
 0x49d   : > { %v1477_v55 = vpop.f32.mrb[83].mxu1  ;;  %3117 = vmatmul.mubr.msk.f32.gmra.mrb[72].mxu0 %vm1010_vm1, %v1475_v54 }
 0x4a0   : > { %v1480_v56 = vpop.f32.mrb[84].mxu1 }
 0x4a1   : > { %v1482_v57 = vpop.f32.mrb[85].mxu1  ;;  %3119 = vmatprep.mubr.msk.f32.mxu0 %vm1010_vm1, %v1480_v56 }
 0x4a4   : > { %v1485_v58 = vpop.f32.mrb[86].mxu1 }
 0x4a5   : > { %v1487_v59 = vpop.f32.mrb[87].mxu1  ;;  %3120 = vmatmul.mubr.msk.f32.gmra.mrb[74].mxu0 %vm1010_vm1, %v1485_v58 }
 0x4a8   : > { %v1490_v60 = vpop.f32.mrb[88].mxu1 }
 0x4a9   : > { %v1492_v61 = vpop.f32.mrb[89].mxu1  ;;  %3122 = vmatprep.mubr.msk.f32.mxu0 %vm1010_vm1, %v1490_v60 }
 0x4ac   : > { %v1495_v62 = vpop.f32.mrb[90].mxu1 }
 0x4ad   : > { %v1497_v63 = vpop.f32.mrb[91].mxu1  ;;  %3123 = vmatmul.mubr.msk.f32.gmra.mrb[76].mxu0 %vm1010_vm1, %v1495_v62 }
 0x4b0   : > { %v1500_v1 = vpop.f32.mrb[92].mxu1 }
 0x4b1   : > { %v1502_v2 = vpop.f32.mrb[93].mxu1  ;;  %3125 = vmatprep.mubr.msk.f32.mxu0 %vm1010_vm1, %v1500_v1 }
 0x4b4   : > { %v1505_v3 = vpop.f32.mrb[94].mxu1 }
 0x4b5   : > { %v1507_v4 = vpop.f32.mrb[95].mxu1  ;;  %3126 = vmatmul.mubr.msk.f32.gmra.mrb[78].mxu0 %vm1010_vm1, %v1505_v3 }
 0x4b8   : > { %v1510_v5 = vpop.f32.mrb[96].mxu1 }
 0x4b9   : > { %v1512_v6 = vpop.f32.mrb[97].mxu1  ;;  %3128 = vmatprep.mubr.msk.f32.mxu0 %vm1010_vm1, %v1510_v5 }
 0x4bc   : > { %v1515_v7 = vpop.f32.mrb[98].mxu1 }
 0x4bd   : > { %v1517_v8 = vpop.f32.mrb[99].mxu1  ;;  %3129 = vmatmul.mubr.msk.f32.gmra.mrb[80].mxu0 %vm1010_vm1, %v1515_v7 }
 0x4c0   : > { %v1520_v9 = vpop.f32.mrb[100].mxu1 }
 0x4c1   : > { %v1522_v10 = vpop.f32.mrb[101].mxu1  ;;  %3131 = vmatprep.mubr.msk.f32.mxu0 %vm1010_vm1, %v1520_v9 }
 0x4c4   : > { %v1525_v13 = vpop.f32.mrb[102].mxu1 }
 0x4c5   : > { %3132 = vmatmul.mubr.msk.f32.gmra.mrb[82].mxu0 %vm1010_vm1, %v1525_v13  ;;  %v1527_v17 = vpop.f32.mrb[103].mxu1 }
 0x4c8   : > { %v1530_v20 = vpop.f32.mrb[104].mxu1 }
 0x4c9   : > { %v1532_v23 = vpop.f32.mrb[105].mxu1  ;;  %3134 = vmatprep.mubr.msk.f32.mxu0 %vm1010_vm1, %v1530_v20 }
 0x4cc   : > { %v1535_v26 = vpop.f32.mrb[106].mxu1 }
 0x4cd   : > { %3135 = vmatmul.mubr.msk.f32.gmra.mrb[84].mxu0 %vm1010_vm1, %v1535_v26  ;;  %v1537_v29 = vpop.f32.mrb[107].mxu1 }
 0x4d0   : > { %v1540_v32 = vpop.f32.mrb[108].mxu1 }
 0x4d1   : > { %v1542_v35 = vpop.f32.mrb[109].mxu1  ;;  %3137 = vmatprep.mubr.msk.f32.mxu0 %vm1010_vm1, %v1540_v32 }
 0x4d4   : > { %v1545_v38 = vpop.f32.mrb[110].mxu1 }
 0x4d5   : > { %3138 = vmatmul.mubr.msk.f32.gmra.mrb[86].mxu0 %vm1010_vm1, %v1545_v38  ;;  %v1547_v44 = vpop.f32.mrb[111].mxu1 }
 0x4d8   : > { %v1550_v47 = vpop.f32.mrb[112].mxu1 }
 0x4d9   : > { %v1552_v50 = vpop.f32.mrb[113].mxu1  ;;  %3140 = vmatprep.mubr.msk.f32.mxu0 %vm1010_vm1, %v1550_v47 }
 0x4dc   : > { %v1555_v45 = vpop.f32.mrb[114].mxu1 }
 0x4dd   : > { %3141 = vmatmul.mubr.msk.f32.gmra.mrb[88].mxu0 %vm1010_vm1, %v1555_v45  ;;  %v1557_v42 = vpop.f32.mrb[115].mxu1 }
 0x4e0   : > { %v1560_v28 = vpop.f32.mrb[116].mxu1 }
 0x4e1   : > { %v1562_v40 = vpop.f32.mrb[117].mxu1  ;;  %3143 = vmatprep.mubr.msk.f32.mxu0 %vm1010_vm1, %v1560_v28 }
 0x4e4   : > { %v1565_v25 = vpop.f32.mrb[118].mxu1 }
 0x4e5   : > { %3144 = vmatmul.mubr.msk.f32.gmra.mrb[90].mxu0 %vm1010_vm1, %v1565_v25  ;;  %v1567_v37 = vpop.f32.mrb[119].mxu1 }
 0x4e8   : > { %v1570_v24 = vpop.f32.mrb[120].mxu1 }
 0x4e9   : > { %v1572_v36 = vpop.f32.mrb[121].mxu1  ;;  %3146 = vmatprep.mubr.msk.f32.mxu0 %vm1010_vm1, %v1570_v24 }
 0x4ec   : > { %v1575_v22 = vpop.f32.mrb[122].mxu1 }
 0x4ed   : > { %3147 = vmatmul.mubr.msk.f32.gmra.mrb[92].mxu0 %vm1010_vm1, %v1575_v22  ;;  %v1577_v49 = vpop.f32.mrb[123].mxu1 }
 0x4f0   : > { %v1580_v15 = vpop.f32.mrb[124].mxu1 }
 0x4f1   : > { %v1582_v34 = vpop.f32.mrb[125].mxu1  ;;  %3149 = vmatprep.mubr.msk.f32.mxu0 %vm1010_vm1, %v1580_v15 }
 0x4f4   : > { %v1585_v14 = vpop.f32.mrb[126].mxu1 }
 0x4f5   : > { %3150 = vmatmul.mubr.msk.f32.gmra.mrb[94].mxu0 %vm1010_vm1, %v1585_v14  ;;  %v1587_v33 = vpop.f32.mrb[127].mxu1 }
 0x550   : > { %v3106_v43 = vpop.f32.mrb[64].mxu0 }
 0x551   : > { %v1761_v16 = vadd.f32 %v3106_v43, %v4396_v11  ;;  %v1755_v31 = vpop.f32.mrb[65].mxu0 }
 0x552   : > { %v1756_v27 = vadd.f32 %v4396_v11, %v1755_v31 }
 0x553   : > { %v1915_v30 = vmax.f32 %v1761_v16, 0.0 }
 0x554   : > { %v1914_v46 = vmax.f32 %v1756_v27, 0.0 }
 0x556   : > { %3154 = vmatprep.mubr.msk.f32.mxu0 %vm652_vm0, %v1914_v46 }
 0x557   : > { %3155 = vmatmul.mubr.msk.f32.vlgmr.msra.gmra.mrb[96].mxu0 %vm652_vm0, %v1915_v30 }
 0x558   : > { %v3109_v18 = vpop.f32.mrb[66].mxu0 }
 0x559   : > { %v1771_v21 = vadd.f32 %v3109_v18, %v4396_v11  ;;  %v1765_v39 = vpop.f32.mrb[67].mxu0 }
 0x55a   : > { %v1766_v19 = vadd.f32 %v4396_v11, %v1765_v39 }
 0x55b   : > { %v1917_v0 = vmax.f32 %v1771_v21, 0.0 }
 0x55c   : > { %v1916_v48 = vmax.f32 %v1766_v19, 0.0 }
 0x55e   : > { %3157 = vmatprep.mubr.msk.f32.mxu0 %vm652_vm0, %v1916_v48 }
 0x55f   : > { %3158 = vmatmul.mubr.msk.f32.gmra.mrb[98].mxu0 %vm652_vm0, %v1917_v0 }
 0x560   : > { %v3112_v12 = vpop.f32.mrb[68].mxu0 }
 0x561   : > { %v1781_v51 = vadd.f32 %v3112_v12, %v4396_v11  ;;  %v1775_v52 = vpop.f32.mrb[69].mxu0 }
 0x562   : > { %v1776_v53 = vadd.f32 %v4396_v11, %v1775_v52 }
 0x563   : > { %v1919_v55 = vmax.f32 %v1781_v51, 0.0 }
 0x564   : > { %v1918_v54 = vmax.f32 %v1776_v53, 0.0 }
 0x566   : > { %3160 = vmatprep.mubr.msk.f32.mxu0 %vm652_vm0, %v1918_v54 }
 0x567   : > { %3161 = vmatmul.mubr.msk.f32.gmra.mrb[100].mxu0 %vm652_vm0, %v1919_v55 }
 0x568   : > { %v3115_v56 = vpop.f32.mrb[70].mxu0 }
 0x569   : > { %v1791_v57 = vadd.f32 %v3115_v56, %v4396_v11  ;;  %v1785_v58 = vpop.f32.mrb[71].mxu0 }
 0x56a   : > { %v1786_v59 = vadd.f32 %v4396_v11, %v1785_v58 }
 0x56b   : > { %v1921_v61 = vmax.f32 %v1791_v57, 0.0 }
 0x56c   : > { %v1920_v60 = vmax.f32 %v1786_v59, 0.0 }
 0x56e   : > { %3163 = vmatprep.mubr.msk.f32.mxu0 %vm652_vm0, %v1920_v60 }
 0x56f   : > { %3164 = vmatmul.mubr.msk.f32.gmra.mrb[102].mxu0 %vm652_vm0, %v1921_v61 }
 0x570   : > { %v3118_v62 = vpop.f32.mrb[72].mxu0 }
 0x571   : > { %v1801_v63 = vadd.f32 %v3118_v62, %v4396_v11  ;;  %v1795_v1 = vpop.f32.mrb[73].mxu0 }
 0x572   : > { %v1796_v2 = vadd.f32 %v4396_v11, %v1795_v1 }
 0x573   : > { %v1923_v4 = vmax.f32 %v1801_v63, 0.0 }
 0x574   : > { %v1922_v3 = vmax.f32 %v1796_v2, 0.0 }
 0x576   : > { %3166 = vmatprep.mubr.msk.f32.mxu0 %vm652_vm0, %v1922_v3 }
 0x577   : > { %3167 = vmatmul.mubr.msk.f32.gmra.mrb[104].mxu0 %vm652_vm0, %v1923_v4 }
 0x578   : > { %v3121_v5 = vpop.f32.mrb[74].mxu0 }
 0x579   : > { %v1811_v6 = vadd.f32 %v3121_v5, %v4396_v11  ;;  %v1805_v7 = vpop.f32.mrb[75].mxu0 }
 0x57a   : > { %v1806_v8 = vadd.f32 %v4396_v11, %v1805_v7 }
 0x57b   : > { %v1925_v10 = vmax.f32 %v1811_v6, 0.0 }
 0x57c   : > { %v1924_v9 = vmax.f32 %v1806_v8, 0.0  ;;  %v4462_v8 = vld [vmem:[#allocation5 + $0x48] ss:$0 sm:$0xff] }
 0x57e   : > { %3169 = vmatprep.mubr.msk.f32.mxu0 %vm652_vm0, %v1924_v9 }
 0x57f   : > { %3170 = vmatmul.mubr.msk.f32.gmra.mrb[106].mxu0 %vm652_vm0, %v1925_v10  ;;  %v4465_v10 = vld [vmem:[%s3730_s29] sm:$0xff] }
 0x580   : > { %v3124_v13 = vpop.f32.mrb[76].mxu0 }
 0x581   : > { %v1821_v17 = vadd.f32 %v3124_v13, %v4396_v11  ;;  %v1815_v20 = vpop.f32.mrb[77].mxu0 }
 0x582   : > { %v1816_v23 = vadd.f32 %v4396_v11, %v1815_v20  ;;  %v416_v20 = vunpack.c.h.bf16 %v4465_v10 }
 0x583   : > { %v1927_v29 = vmax.f32 %v1821_v17, 0.0 }
 0x584   : > { %v1926_v26 = vmax.f32 %v1816_v23, 0.0  ;;  %2367 = vmatprep.mubr.f32.mxu1 %v416_v20 }
 0x586   : > { %3172 = vmatprep.mubr.msk.f32.mxu0 %vm652_vm0, %v1926_v26 }
 0x587   : > { %3173 = vmatmul.mubr.msk.f32.gmra.mrb[108].mxu0 %vm652_vm0, %v1927_v29 }
 0x588   : > { %v3127_v32 = vpop.f32.mrb[78].mxu0 }
 0x589   : > { %v1831_v35 = vadd.f32 %v3127_v32, %v4396_v11  ;;  %v1825_v38 = vpop.f32.mrb[79].mxu0 }
 0x58a   : > { %v1826_v41 = vadd.f32 %v4396_v11, %v1825_v38 }
 0x58b   : > { %v1929_v47 = vmax.f32 %v1831_v35, 0.0 }
 0x58c   : > { %v1928_v44 = vmax.f32 %v1826_v41, 0.0 }
 0x58e   : > { %3175 = vmatprep.mubr.msk.f32.mxu0 %vm652_vm0, %v1928_v44 }
 0x58f   : > { %3176 = vmatmul.mubr.msk.f32.gmra.mrb[110].mxu0 %vm652_vm0, %v1929_v47 }
 0x590   : > { %v3130_v50 = vpop.f32.mrb[80].mxu0 }
 0x591   : > { %v1841_v45 = vadd.f32 %v3130_v50, %v4396_v11  ;;  %v1835_v42 = vpop.f32.mrb[81].mxu0 }
 0x592   : > { %v1836_v28 = vadd.f32 %v4396_v11, %v1835_v42 }
 0x593   : > { %v1931_v25 = vmax.f32 %v1841_v45, 0.0 }
 0x594   : > { %v1930_v40 = vmax.f32 %v1836_v28, 0.0 }
 0x596   : > { %3178 = vmatprep.mubr.msk.f32.mxu0 %vm652_vm0, %v1930_v40 }
 0x597   : > { %3179 = vmatmul.mubr.msk.f32.gmra.mrb[112].mxu0 %vm652_vm0, %v1931_v25 }
 0x598   : > { %v3133_v37 = vpop.f32.mrb[82].mxu0 }
 0x599   : > { %v1851_v24 = vadd.f32 %v3133_v37, %v4396_v11  ;;  %v1845_v36 = vpop.f32.mrb[83].mxu0 }
 0x59a   : > { %v1846_v22 = vadd.f32 %v4396_v11, %v1845_v36 }
 0x59b   : > { %v1933_v15 = vmax.f32 %v1851_v24, 0.0 }
 0x59c   : > { %v1932_v49 = vmax.f32 %v1846_v22, 0.0 }
 0x59e   : > { %3181 = vmatprep.mubr.msk.f32.mxu0 %vm652_vm0, %v1932_v49 }
 0x59f   : > { %3182 = vmatmul.mubr.msk.f32.gmra.mrb[114].mxu0 %vm652_vm0, %v1933_v15 }
 0x5a0   : > { %v3136_v34 = vpop.f32.mrb[84].mxu0 }
 0x5a1   : > { %v1861_v14 = vadd.f32 %v3136_v34, %v4396_v11  ;;  %v1855_v33 = vpop.f32.mrb[85].mxu0 }
 0x5a2   : > { %v1856_v43 = vadd.f32 %v4396_v11, %v1855_v33 }
 0x5a3   : > { %v1935_v31 = vmax.f32 %v1861_v14, 0.0 }
 0x5a4   : > { %v1934_v16 = vmax.f32 %v1856_v43, 0.0 }
 0x5a6   : > { %3184 = vmatprep.mubr.msk.f32.mxu0 %vm652_vm0, %v1934_v16 }
 0x5a7   : > { %3185 = vmatmul.mubr.msk.f32.gmra.mrb[116].mxu0 %vm652_vm0, %v1935_v31 }
 0x5a8   : > { %v3139_v27 = vpop.f32.mrb[86].mxu0 }
 0x5a9   : > { %v1871_v46 = vadd.f32 %v3139_v27, %v4396_v11  ;;  %v1865_v30 = vpop.f32.mrb[87].mxu0 }
 0x5aa   : > { %v1866_v18 = vadd.f32 %v4396_v11, %v1865_v30 }
 0x5ab   : > { %v1937_v39 = vmax.f32 %v1871_v46, 0.0 }
 0x5ac   : > { %v1936_v21 = vmax.f32 %v1866_v18, 0.0 }
 0x5ae   : > { %3187 = vmatprep.mubr.msk.f32.mxu0 %vm652_vm0, %v1936_v21 }
 0x5af   : > { %3188 = vmatmul.mubr.msk.f32.gmra.mrb[118].mxu0 %vm652_vm0, %v1937_v39 }
 0x5b0   : > { %v3142_v19 = vpop.f32.mrb[88].mxu0 }
 0x5b1   : > { %v1881_v48 = vadd.f32 %v3142_v19, %v4396_v11  ;;  %v1875_v0 = vpop.f32.mrb[89].mxu0 }
 0x5b2   : > { %v1876_v12 = vadd.f32 %v4396_v11, %v1875_v0 }
 0x5b3   : > { %v1939_v52 = vmax.f32 %v1881_v48, 0.0 }
 0x5b4   : > { %v1938_v51 = vmax.f32 %v1876_v12, 0.0 }
 0x5b6   : > { %3190 = vmatprep.mubr.msk.f32.mxu0 %vm652_vm0, %v1938_v51 }
 0x5b7   : > { %3191 = vmatmul.mubr.msk.f32.gmra.mrb[120].mxu0 %vm652_vm0, %v1939_v52 }
 0x5b8   : > { %v3145_v53 = vpop.f32.mrb[90].mxu0 }
 0x5b9   : > { %v1891_v54 = vadd.f32 %v3145_v53, %v4396_v11  ;;  %v1885_v55 = vpop.f32.mrb[91].mxu0 }
 0x5ba   : > { %v1886_v56 = vadd.f32 %v4396_v11, %v1885_v55 }
 0x5bb   : > { %v1941_v58 = vmax.f32 %v1891_v54, 0.0 }
 0x5bc   : > { %v1940_v57 = vmax.f32 %v1886_v56, 0.0 }
 0x5be   : > { %3193 = vmatprep.mubr.msk.f32.mxu0 %vm652_vm0, %v1940_v57 }
 0x5bf   : > { %3194 = vmatmul.mubr.msk.f32.gmra.mrb[122].mxu0 %vm652_vm0, %v1941_v58 }
 0x5c0   : > { %v3148_v59 = vpop.f32.mrb[92].mxu0 }
 0x5c1   : > { %v1901_v60 = vadd.f32 %v3148_v59, %v4396_v11  ;;  %v1895_v61 = vpop.f32.mrb[93].mxu0 }
 0x5c2   : > { %v1896_v62 = vadd.f32 %v4396_v11, %v1895_v61 }
 0x5c3   : > { %v1943_v1 = vmax.f32 %v1901_v60, 0.0 }
 0x5c4   : > { %v1942_v63 = vmax.f32 %v1896_v62, 0.0 }
 0x5c6   : > { %3196 = vmatprep.mubr.msk.f32.mxu0 %vm652_vm0, %v1942_v63 }
 0x5c7   : > { %3197 = vmatmul.mubr.msk.f32.gmra.mrb[124].mxu0 %vm652_vm0, %v1943_v1 }
 0x5c8   : > { %v3151_v2 = vpop.f32.mrb[94].mxu0 }
 0x5c9   : > { %v1911_v3 = vadd.f32 %v3151_v2, %v4396_v11  ;;  %v1905_v4 = vpop.f32.mrb[95].mxu0 }
 0x5ca   : > { %v1906_v5 = vadd.f32 %v4396_v11, %v1905_v4 }
 0x5cb   : > { %v1945_v7 = vmax.f32 %v1911_v3, 0.0 }
 0x5cc   : > { %v1944_v6 = vmax.f32 %v1906_v5, 0.0 }
 0x5ce   : > { %3199 = vmatprep.mubr.msk.f32.mxu0 %vm652_vm0, %v1944_v6 }
 0x5cf   : > { %3200 = vmatmul.mubr.msk.f32.gmra.mrb[126].mxu0 %vm652_vm0, %v1945_v7 }
 0x62a   : > { %v3156_v9 = vpop.f32.mrb[96].mxu0 }
 0x62b   : > { %v2118_v13 = vadd.f32 %v3156_v9, %v4462_v8  ;;  %v2112_v17 = vpop.f32.mrb[97].mxu0 }
 0x62c   : > { %v2113_v23 = vadd.f32 %v4462_v8, %v2112_v17 }
 0x62d   : > { %v2272_v26 = vmax.f32 %v2118_v13, 0.0 }
 0x62e   : > { %v2271_v11 = vmax.f32 %v2113_v23, 0.0 }
 0x630   : > { %v3316_v29 = vpack.c.bf16 %v2272_v26, %v2271_v11 }
 0x632   : > { %v3159_v32 = vpop.f32.mrb[98].mxu0 }
 0x633   : > { %v2128_v35 = vadd.f32 %v3159_v32, %v4462_v8  ;;  %v2122_v38 = vpop.f32.mrb[99].mxu0 }
 0x634   : > { %v2123_v41 = vadd.f32 %v4462_v8, %v2122_v38 }
 0x635   : > { %v2274_v44 = vmax.f32 %v2128_v35, 0.0 }
 0x636   : > { %v2273_v47 = vmax.f32 %v2123_v41, 0.0 }
 0x638   : > { %v3320_v50 = vpack.c.bf16 %v2274_v44, %v2273_v47 }
 0x63a   : > { %v3162_v45 = vpop.f32.mrb[100].mxu0 }
 0x63b   : > { %v2138_v42 = vadd.f32 %v3162_v45, %v4462_v8  ;;  %v2132_v28 = vpop.f32.mrb[101].mxu0 }
 0x63c   : > { %v2133_v40 = vadd.f32 %v4462_v8, %v2132_v28 }
 0x63d   : > { %v2276_v25 = vmax.f32 %v2138_v42, 0.0 }
 0x63e   : > { %v2275_v37 = vmax.f32 %v2133_v40, 0.0 }
 0x640   : > { %v4474_v24 = vpack.c.bf16 %v2276_v25, %v2275_v37 }
 0x642   : > { %v3165_v36 = vpop.f32.mrb[102].mxu0 }
 0x643   : > { %v2148_v22 = vadd.f32 %v3165_v36, %v4462_v8  ;;  %v2142_v49 = vpop.f32.mrb[103].mxu0 }
 0x644   : > { %v2143_v15 = vadd.f32 %v4462_v8, %v2142_v49 }
 0x645   : > { %v2278_v34 = vmax.f32 %v2148_v22, 0.0 }
 0x646   : > { %v2277_v14 = vmax.f32 %v2143_v15, 0.0 }
 0x648   : > { %v4478_v33 = vpack.c.bf16 %v2278_v34, %v2277_v14 }
 0x64a   : > { %v3168_v43 = vpop.f32.mrb[104].mxu0 }
 0x64b   : > { %v2158_v16 = vadd.f32 %v3168_v43, %v4462_v8  ;;  %v2152_v31 = vpop.f32.mrb[105].mxu0 }
 0x64c   : > { %v2153_v27 = vadd.f32 %v4462_v8, %v2152_v31 }
 0x64d   : > { %v2280_v46 = vmax.f32 %v2158_v16, 0.0 }
 0x64e   : > { %v2279_v30 = vmax.f32 %v2153_v27, 0.0 }
 0x650   : > { %v4482_v18 = vpack.c.bf16 %v2280_v46, %v2279_v30 }
 0x652   : > { %v3171_v21 = vpop.f32.mrb[106].mxu0 }
 0x653   : > { %v2168_v39 = vadd.f32 %v3171_v21, %v4462_v8  ;;  %v2162_v19 = vpop.f32.mrb[107].mxu0 }
 0x654   : > { %v2163_v48 = vadd.f32 %v4462_v8, %v2162_v19 }
 0x655   : > { %v2282_v0 = vmax.f32 %v2168_v39, 0.0 }
 0x656   : > { %v2281_v12 = vmax.f32 %v2163_v48, 0.0 }
 0x658   : > { %v4486_v51 = vpack.c.bf16 %v2282_v0, %v2281_v12 }
 0x65a   : > { %v3174_v52 = vpop.f32.mrb[108].mxu0 }
 0x65b   : > { %v2178_v53 = vadd.f32 %v3174_v52, %v4462_v8  ;;  %v2172_v54 = vpop.f32.mrb[109].mxu0 }
 0x65c   : > { %v2173_v55 = vadd.f32 %v4462_v8, %v2172_v54 }
 0x65d   : > { %v2284_v56 = vmax.f32 %v2178_v53, 0.0 }
 0x65e   : > { %v2283_v57 = vmax.f32 %v2173_v55, 0.0 }
 0x660   : > { %v4490_v58 = vpack.c.bf16 %v2284_v56, %v2283_v57 }
 0x662   : > { %v3177_v59 = vpop.f32.mrb[110].mxu0 }
 0x663   : > { %v2188_v60 = vadd.f32 %v3177_v59, %v4462_v8  ;;  %v2182_v61 = vpop.f32.mrb[111].mxu0 }
 0x664   : > { %v2183_v62 = vadd.f32 %v4462_v8, %v2182_v61 }
 0x665   : > { %v2286_v63 = vmax.f32 %v2188_v60, 0.0 }
 0x666   : > { %v2285_v1 = vmax.f32 %v2183_v62, 0.0  ;;  %v415_v62 = vunpack.c.l.bf16 %v4465_v10 }
 0x668   : > { %v4494_v2 = vpack.c.bf16 %v2286_v63, %v2285_v1  ;;  %v413_v1 = vld [vmem:[%s3730_s29 + $0x10] sm:$0xff] }
 0x66a   : > { %v3180_v3 = vpop.f32.mrb[112].mxu0 }
 0x66b   : > { %v2198_v4 = vadd.f32 %v3180_v3, %v4462_v8  ;;  %v2192_v5 = vpop.f32.mrb[113].mxu0 }
 0x66c   : > { %v2193_v6 = vadd.f32 %v4462_v8, %v2192_v5  ;;  %v414_v5 = vld [vmem:[%s3730_s29 + $0x18] sm:$0xff] }
 0x66d   : > { %v2288_v7 = vmax.f32 %v2198_v4, 0.0  ;;  %v420_v4 = vunpack.c.h.bf16 %v413_v1 }
 0x66e   : > { %v2287_v9 = vmax.f32 %v2193_v6, 0.0  ;;  %v421_v6 = vunpack.c.l.bf16 %v414_v5 }
 0x670   : > { %v3314_v13 = vpack.c.bf16 %v2288_v7, %v2287_v9  ;;  %v281_v7 = vld [vmem:[#allocation5 + $0x50] sm:$0xff] }
 0x672   : > { %v3183_v17 = vpop.f32.mrb[114].mxu0  ;;  %3315 = vmatprep.subr.bf16.mxu1 %v3314_v13 }
 0x673   : > { %v2208_v20 = vadd.f32 %v3183_v17, %v4462_v8  ;;  %v2202_v23 = vpop.f32.mrb[115].mxu0  ;;  %3317 = vmatpush3.bf16.msra.mxu1 %v3316_v29 }
 0x674   : > { %v2203_v26 = vadd.f32 %v4462_v8, %v2202_v23 }
 0x675   : > { %v2290_v11 = vmax.f32 %v2208_v20, 0.0 }
 0x676   : > { %v2289_v32 = vmax.f32 %v2203_v26, 0.0 }
 0x678   : > { %v3318_v35 = vpack.c.bf16 %v2290_v11, %v2289_v32 }
 0x67a   : > { %v3186_v38 = vpop.f32.mrb[116].mxu0  ;;  %3319 = vmatprep.subr.bf16.mxu1 %v3318_v35 }
 0x67b   : > { %v2218_v41 = vadd.f32 %v3186_v38, %v4462_v8  ;;  %v2212_v44 = vpop.f32.mrb[117].mxu0  ;;  %3321 = vmatpush3.bf16.msra.mxu1 %v3320_v50 }
 0x67c   : > { %v2213_v47 = vadd.f32 %v4462_v8, %v2212_v44 }
 0x67d   : > { %v2292_v45 = vmax.f32 %v2218_v41, 0.0  ;;  %v2801_v41 = vld [vmem:[#allocation5 + $0x58] ss:$0 sm:$0xff] }
 0x67e   : > { %v2291_v42 = vmax.f32 %v2213_v47, 0.0 }
 0x680   : > { %v3322_v28 = vpack.c.bf16 %v2292_v45, %v2291_v42 }
 0x682   : > { %v3189_v40 = vpop.f32.mrb[118].mxu0  ;;  %3323 = vmatprep.subr.bf16.mxu1 %v3322_v28 }
 0x683   : > { %v2228_v29 = vadd.f32 %v3189_v40, %v4462_v8  ;;  %v2222_v25 = vpop.f32.mrb[119].mxu0  ;;  %3325 = vmatpush3.bf16.msra.mxu1 %v4474_v24 }
 0x684   : > { %v2223_v37 = vadd.f32 %v4462_v8, %v2222_v25 }
 0x685   : > { %v2294_v36 = vmax.f32 %v2228_v29, 0.0 }
 0x686   : > { %v2293_v22 = vmax.f32 %v2223_v37, 0.0 }
 0x688   : > { %v3326_v49 = vpack.c.bf16 %v2294_v36, %v2293_v22 }
 0x68a   : > { %v3192_v15 = vpop.f32.mrb[120].mxu0  ;;  %3327 = vmatprep.subr.bf16.mxu1 %v3326_v49 }
 0x68b   : > { %v2238_v50 = vadd.f32 %v3192_v15, %v4462_v8  ;;  %v2232_v34 = vpop.f32.mrb[121].mxu0  ;;  %3329 = vmatpush3.bf16.msra.mxu1 %v4478_v33 }
 0x68c   : > { %v2233_v14 = vadd.f32 %v4462_v8, %v2232_v34 }
 0x68d   : > { %v2296_v43 = vmax.f32 %v2238_v50, 0.0 }
 0x68e   : > { %v2295_v16 = vmax.f32 %v2233_v14, 0.0 }
 0x690   : > { %v3330_v31 = vpack.c.bf16 %v2296_v43, %v2295_v16 }
 0x692   : > { %v3195_v27 = vpop.f32.mrb[122].mxu0  ;;  %3331 = vmatprep.subr.bf16.mxu1 %v3330_v31 }
 0x693   : > { %v2248_v24 = vadd.f32 %v3195_v27, %v4462_v8  ;;  %v2242_v46 = vpop.f32.mrb[123].mxu0  ;;  %3333 = vmatpush3.bf16.msra.mxu1 %v4482_v18 }
 0x694   : > { %v2243_v30 = vadd.f32 %v4462_v8, %v2242_v46 }
 0x695   : > { %v2298_v21 = vmax.f32 %v2248_v24, 0.0 }
 0x696   : > { %v2297_v39 = vmax.f32 %v2243_v30, 0.0 }
 0x698   : > { %v3334_v19 = vpack.c.bf16 %v2298_v21, %v2297_v39 }
 0x69a   : > { %v3198_v48 = vpop.f32.mrb[124].mxu0  ;;  %3335 = vmatprep.subr.bf16.mxu1 %v3334_v19 }
 0x69b   : > { %v2258_v33 = vadd.f32 %v3198_v48, %v4462_v8  ;;  %v2252_v0 = vpop.f32.mrb[125].mxu0  ;;  %3337 = vmatpush3.bf16.msra.mxu1 %v4486_v51  ;;  %v412_v51 = vld [vmem:[%s3730_s29 + $0x8] sm:$0xff]  ;;  %s3482_s29 = scalar_lea.vmem %s4529_s26, 512 }
 0x69c   : > { %v2253_v12 = vadd.f32 %v4462_v8, %v2252_v0  ;;  %v418_v63 = vunpack.c.h.bf16 %v412_v51  ;;  %v417_v3 = vunpack.c.l.bf16 %v412_v51  ;;  %p3483_p6 = scmp.ne.s32.totalorder %s4529_s26, %s3482_s29  ;;  %p3490_p3 = scmp.lt.s32.totalorder %s3488_s12, %s3482_s29 }
 0x69d   : > { %v2300_v52 = vmax.f32 %v2258_v33, 0.0 }
 0x69e   : > { %v2299_v53 = vmax.f32 %v2253_v12, 0.0  ;;  %p3484_p8 = pnand %p3483_p6, %p3673_p12  ;;  %p3491_p7 = por %p3490_p3, %p3489_p13 }
 0x6a0   : > { %v3338_v54 = vpack.c.bf16 %v2300_v52, %v2299_v53  ;;  %p3485_p11 = pneg %p3484_p8 }
 0x6a2   : > { %v3201_v18 = vpop.f32.mrb[126].mxu0  ;;  %3339 = vmatprep.subr.bf16.mxu1 %v3338_v54  ;;  %p3492_p9 = pnand %p3491_p7, %p3485_p11 }
 0x6a3   : > { %v2268_v55 = vadd.f32 %v3201_v18, %v4462_v8  ;;  %v2262_v56 = vpop.f32.mrb[127].mxu0  ;;  %3341 = vmatpush3.bf16.msra.mxu1 %v4490_v58  ;;  %v419_v58 = vunpack.c.l.bf16 %v413_v1 }
 0x6a4   : > { %v2263_v57 = vadd.f32 %v4462_v8, %v2262_v56  ;;  %v422_v8 = vunpack.c.h.bf16 %v414_v5 }
 0x6a5   : > { %v2302_v59 = vmax.f32 %v2268_v55, 0.0 }
 0x6a6   : > { %v2301_v60 = vmax.f32 %v2263_v57, 0.0 }
 0x6a8   : > { %v3342_v61 = vpack.c.bf16 %v2302_v59, %v2301_v60 }
 0x6aa   : > { %3343 = vmatprep.subr.bf16.mxu1 %v3342_v61 }
 0x6ab   : > { %3345 = vmatpush3.bf16.msra.mxu1 %v4494_v2 }
 0x6ac   : > { %3202 = vmatprep.subr.mxu1 %v281_v7 }
 0x6ae   : > { %2368 = vmatmul.mubr.f32.vlgmr.msra.gmra.mrb[128].mxu1 %v415_v62 }
 0x6af   : > { %2372 = vmatprep.mubr.f32.mxu1 %v418_v63  ;;  %3203 = vmatpush3.msra.mxu1 %v281_v7 }
 0x6b2   : > { %2373 = vmatmul.mubr.f32.gmra.mrb[130].mxu1 %v417_v3 }
 0x6b3   : > { %2377 = vmatprep.mubr.f32.mxu1 %v420_v4 }
 0x6b6   : > { %2378 = vmatmul.mubr.f32.gmra.mrb[132].mxu1 %v419_v58 }
 0x6b7   : > { %2382 = vmatprep.mubr.f32.mxu1 %v422_v8 }
 0x6ba   : > { %2383 = vmatmul.mubr.f32.gmra.mrb[134].mxu1 %v421_v6 }
 0x781   : > { %v2981_v10 = vpop.f32.mrb[128].mxu1 }
 0x782   : > { %v2982_v2 = vpop.f32.mrb[129].mxu1 }
 0x783   : > { %v2983_v9 = vadd.f32 %v2982_v2, %v2981_v10 }
 0x785   : > { %v2984_v13 = vpop.f32.mrb[130].mxu1  ;;  %3204 = vmatprep.mubr.msk.f32.mxu1 %vm652_vm0, %v2983_v9 }
 0x786   : > { %v2985_v17 = vpop.f32.mrb[131].mxu1 }
 0x787   : > { %v2986_v20 = vadd.f32 %v2985_v17, %v2984_v13 }
 0x789   : > { %3205 = vmatmul.mubr.msk.f32.vlgmr.msra.gmra.mrb[136].mxu1 %vm652_vm0, %v2986_v20  ;;  %v2987_v23 = vpop.f32.mrb[132].mxu1 }
 0x78a   : > { %v2988_v26 = vpop.f32.mrb[133].mxu1 }
 0x78b   : > { %v2989_v11 = vadd.f32 %v2988_v26, %v2987_v23 }
 0x78d   : > { %v2990_v32 = vpop.f32.mrb[134].mxu1  ;;  %3207 = vmatprep.mubr.msk.f32.mxu1 %vm652_vm0, %v2989_v11 }
 0x78e   : > { %v2991_v35 = vpop.f32.mrb[135].mxu1 }
 0x78f   : > { %v2992_v38 = vadd.f32 %v2991_v35, %v2990_v32 }
 0x791   : > { %3208 = vmatmul.mubr.msk.f32.gmra.mrb[138].mxu1 %vm652_vm0, %v2992_v38 }
 0x85c   : > { %v3206_v44 = vpop.f32.mrb[136].mxu1 }
 0x85d   : > { %v2470_v47 = vpop.f32.mrb[137].mxu1  ;;  %v2476_v42 = vadd.f32 %v3206_v44, %v2801_v41 }
 0x85e   : > { %v2471_v45 = vadd.f32 %v2801_v41, %v2470_v47 }
 0x860   : > { %2489 = vmax.xlane.f32.xlu0 %v2471_v45 }
 0x864   : > { %v3209_v28 = vpop.f32.mrb[138].mxu1  ;;  %2491 = vmax.xlane.f32.xlu0 %v2476_v42 }
 0x865   : > { %v2480_v40 = vpop.f32.mrb[139].mxu1  ;;  %v2486_v25 = vadd.f32 %v3209_v28, %v2801_v41 }
 0x866   : > { %v2481_v29 = vadd.f32 %v2801_v41, %v2480_v40 }
 0x868   : > { %2493 = vmax.xlane.f32.xlu1 %v2481_v29 }
 0x86c   : > { %2495 = vmax.xlane.f32.xlu1 %v2486_v25 }
 0x8ed   : > { %v2490_v37 = vpop.xlane.xlu0 %2489 }
 0x8ee   : > { %v2497_v36 = vsub.f32 %v2471_v45, %v2490_v37 }
 0x8f0   : > { %v2501_v22 = vmul.f32 1.442695, %v2497_v36 }
 0x8f1   : > { %v2492_v49 = vpop.xlane.xlu0 %2491 }
 0x8f2   : > { %3408 = vpow2.f32 %v2501_v22  ;;  %v2498_v15 = vsub.f32 %v2476_v42, %v2492_v49 }
 0x8f4   : > { %v2503_v50 = vmul.f32 1.442695, %v2498_v15 }
 0x8f5   : > { %v2494_v34 = vpop.xlane.xlu1 %2493 }
 0x8f6   : > { %3410 = vpow2.f32 %v2503_v50  ;;  %v2499_v14 = vsub.f32 %v2481_v29, %v2494_v34 }
 0x8f8   : > { %v2505_v43 = vmul.f32 1.442695, %v2499_v14 }
 0x8f9   : > { %v2496_v16 = vpop.xlane.xlu1 %2495 }
 0x8fa   : > { %3412 = vpow2.f32 %v2505_v43  ;;  %v2500_v31 = vsub.f32 %v2486_v25, %v2496_v16 }
 0x8fc   : > { %v3409_v27 = vpop.eup %3408  ;;  %v2507_v24 = vmul.f32 1.442695, %v2500_v31 }
 0x8fd   : > { %2509 = vadd.xlane.f32.xlu0 %v3409_v27 }
 0x8fe   : > { %3414 = vpow2.f32 %v2507_v24 }
 0x900   : > { %v3411_v46 = vpop.eup %3410 }
 0x901   : > { %2511 = vadd.xlane.f32.xlu1 %v3411_v46 }
 0x904   : > { %v3413_v30 = vpop.eup %3412 }
 0x905   : > { %2513 = vadd.xlane.f32.xlu0 %v3413_v30 }
 0x908   : > { %v3415_v21 = vpop.eup %3414 }
 0x909   : > { %2515 = vadd.xlane.f32.xlu1 %v3415_v21 }
 0x98a   : > { %v2510_v39 = vpop.xlane.xlu0 %2509 }
 0x98b   : > { %3416 = vlog2.f32 %v2510_v39 }
 0x98e   : > { %v2512_v19 = vpop.xlane.xlu1 %2511 }
 0x98f   : > { %3418 = vlog2.f32 %v2512_v19 }
 0x992   : > { %v2514_v48 = vpop.xlane.xlu0 %2513 }
 0x993   : > { %3420 = vlog2.f32 %v2514_v48 }
 0x995   : > { %v3417_v33 = vpop.eup %3416 }
 0x996   : > { %v2518_v0 = vmul.f32 0.6931472, %v3417_v33  ;;  %v2516_v12 = vpop.xlane.xlu1 %2515 }
 0x997   : > { %3422 = vlog2.f32 %v2516_v12 }
 0x998   : > { %v2525_v52 = vsub.f32 %v2497_v36, %v2518_v0 }
 0x999   : > { %v3419_v53 = vpop.eup %3418 }
 0x99a   : > { %2529 = vst [vmem:[%s260_s7] sm:$0xff] %v2525_v52  ;;  %v2520_v54 = vmul.f32 0.6931472, %v3419_v53 }
 0x99c   : > { %v2526_v18 = vsub.f32 %v2498_v15, %v2520_v54 }
 0x99d   : > { %v3421_v55 = vpop.eup %3420 }
 0x99e   : > { %2530 = vst [vmem:[%s260_s7 + $0x8] sm:$0xff] %v2526_v18  ;;  %v2522_v56 = vmul.f32 0.6931472, %v3421_v55 }
 0x9a0   : > { %v2527_v57 = vsub.f32 %v2499_v14, %v2522_v56 }
 0x9a1   : > { %v3423_v59 = vpop.eup %3422 }
 0x9a2   : > { %2531 = vst [vmem:[%s260_s7 + $0x10] sm:$0xff] %v2527_v57  ;;  %v2524_v60 = vmul.f32 0.6931472, %v3423_v59 }
 0x9a4   : > { %v2528_v61 = vsub.f32 %v2500_v31, %v2524_v60 }
 0x9a6   : > { %2532 = vst [vmem:[%s260_s7 + $0x18] sm:$0xff] %v2528_v61 }
 0x9a7   : > { %3495 = shalt.err (!%p3492_p9)
}
 0x9a8   : > { %s3496_s13 = scalar_lea.hbm %s4534_s20, 512  ;;  %s3500_s21 = scalar_lea.hbm %s4581_s4, 2048 }
 0x9a9   : > { %p3497_p1 = scmp.ne.s32.totalorder %s4534_s20, %s3496_s13  ;;  %p3501_p10 = scmp.lt.u32.totalorder %s4534_s20, %s4581_s4 }
 0x9aa   : > { %p3502_p2 = scmp.lt.u32.totalorder %s3500_s21, %s3496_s13  ;;  %p3504_p6 = scmp.lt.u32.totalorder %s3496_s13, %s4534_s20 }
 0x9ab   : > { %p3498_p0 = pnand %p3497_p1, %p3673_p12 }
 0x9ac   : > { %p3503_p4 = por %p3502_p2, %p3501_p10 }
 0x9ad   : > { %p3499_p5 = pneg %p3498_p0 }
 0x9ae   : > { %p3505_p8 = por %p3504_p6, %p3503_p4 }
 0x9b0   : > { %p3506_p11 = pnand %p3505_p8, %p3499_p5 }
 0x9b2   : > { %3509 = shalt.err (!%p3506_p11)
}
 0x9b3   : > { %s3560_s7 = smov 128   ;;  %s3561_s8 = smov 8  }
 0x9b4   : > { %3352 = dma.vmem_to_hbm [thread:$0]  (%p3673_p12), %s4529_s26, 512, %s4534_s20, %s2534_s5, %s3560_s7, %s3560_s7, %s3561_s8  }
 0x9b5 PF: > { %p3369_p13 = scmp.ge.s32.totalorder %s3552_s18, 2  ;;  %s2562_s25 = sand.u32 1, %s3540_s15  }
 0x9b6   : > { %p4692_p3 = scmp.ne.s32.totalorder %s4634_s22, 0  ;;  %s2563_s14 = scalar_lea.sflag [#allocation4], %s2562_s25 }
 0x9b8   : > { %p3363_p7 = pnand %p3369_p13, %p4692_p3 }
 0x9ba   : > { %3535 = dma.done.wait (!%p3363_p7), %s2563_s14, 512  }
 0x9bb   : > { %3537 = vsyncadd (!%p3363_p7), %s2563_s14, 4294966784  ;;  %p18_p9 = scmp.ge.s32.totalorder %s3640_s27, 6   ;;  %s4693_s15 = smov %s3544_s16 }
 0x9bc   : > { %s4694_s16 = smov %s3548_s17  ;;  %s4695_s17 = smov %s3669_s24 }
 0x9bd   : > { %s4696_s18 = smov %s3640_s27  ;;  %20 = sbr.rel (!%p18_p9) target bundleno = 6 (0x6), region = 91 }
 0x9c4   :  { %2568 = vsyncpa [#allocation3], 1 }
 0x9c5   :  { %2570 = vsyncpa [#allocation3 + $0x1], 1 }
 0x9c6   :  { %2571 = vsyncpa [#allocation6], 1 }
 0x9c7   :  { %2572 = vsyncpa [#allocation4], 1 }
 0x9c8   :  { %2574 = vsyncpa [#allocation4 + $0x1], 1 }

</bundles_post_ra>
